<compile_context>
chip_gen: v5e
topology: v5e:2x2
jax: 0.10.0
libtpu: 0.0.40
codegen_flags: <defaults>
</compile_context>

<pallas_src>
import functools
import math

import jax
import jax.numpy as jnp
import numpy as np
from jax.experimental import pallas as pl
from jax.experimental.pallas import tpu as pltpu


def _round_up(v, m):
    return ((v + m - 1) // m) * m


def fte_kernel(x_ref, vec_ref, weq_ref, w0_ref, b0_ref, w2_ref, b2_ref,
               dx_ref, dvec_ref, *, inv_sqrt_2, inv_sqrt_h):
    """One node tile.

    x_ref    : (TN, Hp)       compute dtype (bf16 or f32)
    vec_ref  : (3, TN, Hp)    compute dtype
    weq_ref  : (Hp, 2*Hp)     [W_eq vec1-half | vec2-half], transposed
    w0_ref   : (2*Hp, Hp)     stacked [rows acting on x ; rows acting on scalar]
    b0_ref   : (1, Hp)        f32
    w2_ref   : (Hp, 2*Hp)     [ (xvec1+xvec2) fold | xvec3 ], transposed
    b2_ref   : (1, 2*Hp)      f32
    dx_ref   : (TN, Hp)
    dvec_ref : (3, TN, Hp)
    """
    _, tn, hp = vec_ref.shape
    cdt = weq_ref.dtype
    prec = jax.lax.Precision.HIGHEST if cdt == jnp.float32 else None

    x = x_ref[...]

    # --- equi_proj: single MXU pass on the stacked (3*TN, Hp) LHS -------------
    vflat = vec_ref[...].reshape(3 * tn, hp)          # free leading-dim collapse
    vproj = jnp.dot(vflat, weq_ref[...], precision=prec,
                    preferred_element_type=jnp.float32)         # (3*TN, 2*Hp)
    v1 = vproj[:, :hp].reshape(3, tn, hp)             # 128-aligned lane slices
    v2 = vproj[:, hp:].reshape(3, tn, hp)

    # --- invariants: 3-axis reductions are plain VPU adds (f32) ---------------
    scalar = jnp.sqrt(jnp.sum(v1 * v1, axis=0))                 # (TN, Hp)
    vec_dot = jnp.sum(v1 * v2, axis=0) * inv_sqrt_h             # (TN, Hp)

    # --- xequi_proj MLP: one K=2*Hp matmul, one N=2*Hp matmul -----------------
    xs = jnp.concatenate([x, scalar.astype(cdt)], axis=-1)      # lane concat @128
    h = jnp.dot(xs, w0_ref[...], precision=prec,
                preferred_element_type=jnp.float32) + b0_ref[...]
    h = h * jax.nn.sigmoid(h)                                   # SiLU (f32, EUP)

    out2 = jnp.dot(h.astype(cdt), w2_ref[...], precision=prec,
                   preferred_element_type=jnp.float32) + b2_ref[...]
    dx12 = out2[:, :hp]                                         # folded xv1 + xv2
    xvec3 = out2[:, hp:]

    dx_ref[...] = ((dx12 + vec_dot) * inv_sqrt_2).astype(dx_ref.dtype)
    dvec_ref[...] = (xvec3[None, :, :] * v2).astype(dvec_ref.dtype)  # one block store


def fte_forward(x, vec, node_frame, params, *,
                tile_n=512,
                compute_dtype=jnp.bfloat16,
                out_dtype=jnp.float32,
                vmem_budget_bytes=44 * 1024 * 1024,   # v7x-safe (<64 MiB physical)
                weight_buffering=None):
    """dx, dvec = FTE(x, vec, node_frame).

    node_frame only feeds dead code in the reference forward, so it is accepted
    for API fidelity but ignored.  Set weight_buffering=1 on v7x with large Hp
    to single-buffer the resident weights (pl.Buffered(1)).
    """
    del node_frame
    W_eq, W0, b0, W2, b2 = params
    N, H = x.shape
    inv_sqrt_2 = 1.0 / math.sqrt(2.0)
    inv_sqrt_h = 1.0 / math.sqrt(H)

    Hp = _round_up(H, 128)                       # lane-dense outputs, no masked vst
    in_item = jnp.dtype(compute_dtype).itemsize
    out_item = jnp.dtype(out_dtype).itemsize

    # --- node-tile size from the VMEM budget; keep >= 2 grid steps (2 TCs) ----
    weight_bytes = 2 * (6 * Hp * Hp * in_item + 3 * Hp * 4)       # conservative 2x
    per_row = (2 * 4 * Hp * (in_item + out_item)   # double-buffered x/vec/dx/dvec
               + 24 * Hp * 4)                      # in-kernel f32 intermediates
    max_tn = max(8, ((vmem_budget_bytes - weight_bytes) // per_row) // 8 * 8)

    tn = min(_round_up(tile_n, 8), _round_up(N, 8), max_tn)
    if _round_up(N, tn) == tn and N > 8:           # single tile -> split across cores
        tn = min(tn, _round_up((N + 1) // 2, 8))
    Np = _round_up(N, tn)

    def pad2(a, rows, cols):
        return jnp.pad(a, ((0, rows - a.shape[0]), (0, cols - a.shape[1])))

    # --- weight prep: transpose, split/fold, zero-pad to Hp, concat -----------
    weq = jnp.concatenate(
        [pad2(W_eq[:H].T, Hp, Hp), pad2(W_eq[H:].T, Hp, Hp)], axis=1
    ).astype(compute_dtype)                                       # (Hp, 2*Hp)
    w0 = jnp.concatenate(
        [pad2(W0[:, :H].T, Hp, Hp), pad2(W0[:, H:].T, Hp, Hp)], axis=0
    ).astype(compute_dtype)                                       # (2*Hp, Hp)
    b0p = pad2(b0.reshape(1, H), 1, Hp).astype(jnp.float32)
    w2 = jnp.concatenate(
        [pad2((W2[:H] + W2[H:2 * H]).T, Hp, Hp), pad2(W2[2 * H:].T, Hp, Hp)], axis=1
    ).astype(compute_dtype)                                       # (Hp, 2*Hp)
    b2p = jnp.concatenate(
        [pad2((b2[:H] + b2[H:2 * H]).reshape(1, H), 1, Hp),
         pad2(b2[2 * H:].reshape(1, H), 1, Hp)], axis=1
    ).astype(jnp.float32)                                         # (1, 2*Hp)

    # --- activation prep (NOTE: keep vec in (3, N, H) persistently across
    #     stacked FTE layers to avoid paying this transpose per call) ----------
    xp = pad2(x, Np, Hp).astype(compute_dtype)
    vecp = jnp.pad(jnp.transpose(vec, (1, 0, 2)),
                   ((0, 0), (0, Np - N), (0, Hp - H))).astype(compute_dtype)

    kernel = functools.partial(fte_kernel,
                               inv_sqrt_2=inv_sqrt_2, inv_sqrt_h=inv_sqrt_h)

    wkw = {} if weight_buffering is None else {
        "pipeline_mode": pl.Buffered(weight_buffering)}
    const = lambda i: (0, 0)

    in_specs = [
        pl.BlockSpec((tn, Hp), lambda i: (i, 0)),               # x
        pl.BlockSpec((3, tn, Hp), lambda i: (0, i, 0)),         # vec (3, N, H)
        pl.BlockSpec((Hp, 2 * Hp), const, **wkw),               # W_eq  [v1|v2]
        pl.BlockSpec((2 * Hp, Hp), const, **wkw),               # W0 stacked
        pl.BlockSpec((1, Hp), const, **wkw),                    # b0
        pl.BlockSpec((Hp, 2 * Hp), const, **wkw),               # W2 [fold|xvec3]
        pl.BlockSpec((1, 2 * Hp), const, **wkw),                # b2 [fold|xvec3]
    ]
    out_specs = (
        pl.BlockSpec((tn, Hp), lambda i: (i, 0)),               # dx
        pl.BlockSpec((3, tn, Hp), lambda i: (0, i, 0)),         # dvec
    )
    out_shape = (
        jax.ShapeDtypeStruct((Np, Hp), out_dtype),
        jax.ShapeDtypeStruct((3, Np, Hp), out_dtype),
    )

    grid_spec = pl.GridSpec(grid=(Np // tn,), in_specs=in_specs, out_specs=out_specs)

    flops = 20 * Np * Hp * Hp                    # 3 fused matmuls per node row
    bytes_accessed = (4 * Np * Hp * in_item                      # x + vec in
                      + 6 * Hp * Hp * in_item + 3 * Hp * 4       # weights + biases
                      + 4 * Np * Hp * out_item)                  # dx + dvec out
    cost = pl.CostEstimate(flops=int(flops),
                           transcendentals=int(2 * Np * Hp),
                           bytes_accessed=int(bytes_accessed))

    est = weight_bytes + tn * per_row
    vmem_limit = int(min(max(32 * 1024 * 1024, 2 * est), 56 * 1024 * 1024))

    dx_p, dvec_p = pl.pallas_call(
        kernel,
        out_shape=out_shape,
        grid_spec=grid_spec,
        compiler_params=pltpu.CompilerParams(
            dimension_semantics=("parallel",),
            vmem_limit_bytes=vmem_limit,
        ),
        cost_estimate=cost,
    )(xp, vecp, weq, w0, b0p, w2, b2p)

    dx = dx_p[:N, :H]
    dvec = jnp.transpose(dvec_p[:, :N, :H], (1, 0, 2))           # back to (N, 3, H)
    return dx, dvec


def init_params(key, H):
    """Deterministic parameter init mirroring FTE.reset_parameters()."""
    k1, k2, k3 = jax.random.split(key, 3)

    def xavier(k, out_f, in_f):
        bound = math.sqrt(6.0 / (in_f + out_f))
        return jax.random.uniform(k, (out_f, in_f), jnp.float32, -bound, bound)

    W_eq = xavier(k1, 2 * H, H)     # equi_proj.weight     (2H, H), no bias
    W0 = xavier(k2, H, 2 * H)       # xequi_proj[0].weight (H, 2H)
    b0 = jnp.zeros((H,), jnp.float32)
    W2 = xavier(k3, 3 * H, H)       # xequi_proj[2].weight (3H, H)
    b2 = jnp.zeros((3 * H,), jnp.float32)
    return W_eq, W0, b0, W2, b2


def fte_reference(x, vec, frame, params):
    """Pure-JAX reference matching the PyTorch forward exactly."""
    W_eq, W0, b0, W2, b2 = params
    H = x.shape[-1]
    vproj = vec @ W_eq.T
    vec1, vec2 = vproj[..., :H], vproj[..., H:]
    scalar = jnp.sqrt(jnp.sum(vec1 * vec1, axis=-2))
    vec_dot = jnp.sum(vec1 * vec2, axis=1) * (1.0 / math.sqrt(H))
    h = jnp.concatenate([x, scalar], axis=-1) @ W0.T + b0
    h = h * jax.nn.sigmoid(h)
    out = h @ W2.T + b2
    xv1, xv2, xv3 = out[:, :H], out[:, H:2 * H], out[:, 2 * H:]
    dx = (xv1 + xv2 + vec_dot) * (1.0 / math.sqrt(2.0))
    dvec = xv3[:, None, :] * vec2
    return dx, dvec


if __name__ == "__main__":
    N, H = 16, 32  # nodes, hidden_channels

    key = jax.random.PRNGKey(0)
    kx, kv, kf, kp = jax.random.split(key, 4)

    x = jax.random.normal(kx, (N, H), jnp.float32)
    vec = jax.random.normal(kv, (N, 3, H), jnp.float32)
    node_frame = jax.random.normal(kf, (N, 3, 3), jnp.float32)
    params = init_params(kp, H)

    with jax.default_matmul_precision("highest"):
        dx_ref, dvec_ref = fte_reference(x, vec, node_frame, params)
    dx_ref, dvec_ref = jax.block_until_ready((dx_ref, dvec_ref))

    # Strict-accuracy path: f32 MXU operands (HIGHEST precision).
    dx32, dvec32 = jax.block_until_ready(
        fte_forward(x, vec, node_frame, params, compute_dtype=jnp.float32))
    np.testing.assert_allclose(np.asarray(dx32), np.asarray(dx_ref),
                               rtol=1e-4, atol=1e-4)
    np.testing.assert_allclose(np.asarray(dvec32), np.asarray(dvec_ref),
                               rtol=1e-4, atol=1e-4)

    # Production path: bf16 MXU operands, f32 accumulation (looser tolerance).
    dxbf, dvecbf = jax.block_until_ready(fte_forward(x, vec, node_frame, params))
    np.testing.assert_allclose(np.asarray(dxbf), np.asarray(dx_ref),
                               rtol=8e-2, atol=8e-2)
    np.testing.assert_allclose(np.asarray(dvecbf), np.asarray(dvec_ref),
                               rtol=8e-2, atol=8e-2)

    print("KERNEL_OK")
</pallas_src>

<mosaic_0001>
module attributes {stable_mosaic.version = 11 : i64} {
  func.func @fte_kernel(%arg0: i32, %arg1: memref<8x128xf32, #tpu.memory_space<vmem>>, %arg2: memref<3x8x128xf32, #tpu.memory_space<vmem>>, %arg3: memref<128x256xf32, #tpu.memory_space<vmem>>, %arg4: memref<256x128xf32, #tpu.memory_space<vmem>>, %arg5: memref<1x128xf32, #tpu.memory_space<vmem>>, %arg6: memref<128x256xf32, #tpu.memory_space<vmem>>, %arg7: memref<1x256xf32, #tpu.memory_space<vmem>>, %arg8: memref<8x128xf32, #tpu.memory_space<vmem>>, %arg9: memref<3x8x128xf32, #tpu.memory_space<vmem>>) attributes {dimension_semantics = [#tpu.dimension_semantics<parallel>], iteration_bounds = array<i64: 2>, scalar_prefetch = 0 : i64, scratch_operands = 0 : i64, tpu.core_type = #tpu.core_type<tc>, window_params = [{transform_indices = @transform_0, window_bounds = array<i64: 8, 128>}, {transform_indices = @transform_1, window_bounds = array<i64: 3, 8, 128>}, {pipeline_mode = #tpu.pipeline_mode<synchronous>, transform_indices = @transform_2, window_bounds = array<i64: 128, 256>}, {pipeline_mode = #tpu.pipeline_mode<synchronous>, transform_indices = @transform_3, window_bounds = array<i64: 256, 128>}, {pipeline_mode = #tpu.pipeline_mode<synchronous>, transform_indices = @transform_4, window_bounds = array<i64: 1, 128>}, {pipeline_mode = #tpu.pipeline_mode<synchronous>, transform_indices = @transform_5, window_bounds = array<i64: 128, 256>}, {pipeline_mode = #tpu.pipeline_mode<synchronous>, transform_indices = @transform_6, window_bounds = array<i64: 1, 256>}, {transform_indices = @transform_7, window_bounds = array<i64: 8, 128>}, {transform_indices = @transform_8, window_bounds = array<i64: 3, 8, 128>}]} {
    %c0 = arith.constant 0 : index
    %c0_0 = arith.constant 0 : index
    %0 = vector.load %arg1[%c0, %c0_0] : memref<8x128xf32, #tpu.memory_space<vmem>>, vector<8x128xf32>
    %c0_1 = arith.constant 0 : index
    %c0_2 = arith.constant 0 : index
    %c0_3 = arith.constant 0 : index
    %1 = vector.load %arg2[%c0_1, %c0_2, %c0_3] : memref<3x8x128xf32, #tpu.memory_space<vmem>>, vector<3x8x128xf32>
    %2 = vector.shape_cast %1 : vector<3x8x128xf32> to vector<24x128xf32>
    %c0_4 = arith.constant 0 : index
    %c0_5 = arith.constant 0 : index
    %3 = vector.load %arg3[%c0_4, %c0_5] : memref<128x256xf32, #tpu.memory_space<vmem>>, vector<128x256xf32>
    %cst = arith.constant dense<0.000000e+00> : vector<24x256xf32>
    %4 = tpu.matmul %2, %3, %cst {dimension_numbers = #tpu.dot_dimension_numbers<[1], [0], [0], [1], [0, 0, 1, 1], [], []>, precision = #tpu.contract_precision<fp32>} : vector<24x128xf32>, vector<128x256xf32>, vector<24x256xf32> -> vector<24x256xf32>
    %5 = vector.extract_strided_slice %4 {offsets = [0, 0], sizes = [24, 128], strides = [1, 1]} : vector<24x256xf32> to vector<24x128xf32>
    %6 = vector.shape_cast %5 : vector<24x128xf32> to vector<3x8x128xf32>
    %7 = vector.extract_strided_slice %4 {offsets = [0, 128], sizes = [24, 128], strides = [1, 1]} : vector<24x256xf32> to vector<24x128xf32>
    %8 = vector.shape_cast %7 : vector<24x128xf32> to vector<3x8x128xf32>
    %9 = arith.mulf %6, %6 : vector<3x8x128xf32>
    %cst_6 = arith.constant dense<0.000000e+00> : vector<8x128xf32>
    %10 = vector.multi_reduction <add>, %9, %cst_6 [0] : vector<3x8x128xf32> to vector<8x128xf32>
    %11 = math.sqrt %10 : vector<8x128xf32>
    %12 = arith.mulf %6, %8 : vector<3x8x128xf32>
    %cst_7 = arith.constant dense<0.000000e+00> : vector<8x128xf32>
    %13 = vector.multi_reduction <add>, %12, %cst_7 [0] : vector<3x8x128xf32> to vector<8x128xf32>
    %cst_8 = arith.constant 0.176776692 : f32
    %14 = vector.broadcast %cst_8 : f32 to vector<8x128xf32>
    %15 = arith.mulf %13, %14 : vector<8x128xf32>
    %16 = tpu.concatenate %0, %11 in 1 : vector<8x128xf32>, vector<8x128xf32> -> vector<8x256xf32>
    %c0_9 = arith.constant 0 : index
    %c0_10 = arith.constant 0 : index
    %17 = vector.load %arg4[%c0_9, %c0_10] : memref<256x128xf32, #tpu.memory_space<vmem>>, vector<256x128xf32>
    %cst_11 = arith.constant dense<0.000000e+00> : vector<8x128xf32>
    %18 = tpu.matmul %16, %17, %cst_11 {dimension_numbers = #tpu.dot_dimension_numbers<[1], [0], [0], [1], [0, 0, 1, 1], [], []>, precision = #tpu.contract_precision<fp32>} : vector<8x256xf32>, vector<256x128xf32>, vector<8x128xf32> -> vector<8x128xf32>
    %c0_12 = arith.constant 0 : index
    %c0_13 = arith.constant 0 : index
    %19 = vector.load %arg5[%c0_12, %c0_13] : memref<1x128xf32, #tpu.memory_space<vmem>>, vector<1x128xf32>
    %20 = vector.broadcast %19 : vector<1x128xf32> to vector<8x128xf32>
    %21 = arith.addf %18, %20 : vector<8x128xf32>
    %22 = arith.negf %21 : vector<8x128xf32>
    %23 = math.exp %22 : vector<8x128xf32>
    %cst_14 = arith.constant 1.000000e+00 : f32
    %24 = vector.broadcast %cst_14 : f32 to vector<8x128xf32>
    %25 = arith.addf %24, %23 : vector<8x128xf32>
    %26 = arith.divf %24, %25 : vector<8x128xf32>
    %27 = arith.mulf %21, %26 : vector<8x128xf32>
    %c0_15 = arith.constant 0 : index
    %c0_16 = arith.constant 0 : index
    %28 = vector.load %arg6[%c0_15, %c0_16] : memref<128x256xf32, #tpu.memory_space<vmem>>, vector<128x256xf32>
    %cst_17 = arith.constant dense<0.000000e+00> : vector<8x256xf32>
    %29 = tpu.matmul %27, %28, %cst_17 {dimension_numbers = #tpu.dot_dimension_numbers<[1], [0], [0], [1], [0, 0, 1, 1], [], []>, precision = #tpu.contract_precision<fp32>} : vector<8x128xf32>, vector<128x256xf32>, vector<8x256xf32> -> vector<8x256xf32>
    %c0_18 = arith.constant 0 : index
    %c0_19 = arith.constant 0 : index
    %30 = vector.load %arg7[%c0_18, %c0_19] : memref<1x256xf32, #tpu.memory_space<vmem>>, vector<1x256xf32>
    %31 = vector.broadcast %30 : vector<1x256xf32> to vector<8x256xf32>
    %32 = arith.addf %29, %31 : vector<8x256xf32>
    %33 = vector.extract_strided_slice %32 {offsets = [0, 0], sizes = [8, 128], strides = [1, 1]} : vector<8x256xf32> to vector<8x128xf32>
    %34 = vector.extract_strided_slice %32 {offsets = [0, 128], sizes = [8, 128], strides = [1, 1]} : vector<8x256xf32> to vector<8x128xf32>
    %35 = arith.addf %33, %15 : vector<8x128xf32>
    %cst_20 = arith.constant 0.707106769 : f32
    %36 = vector.broadcast %cst_20 : f32 to vector<8x128xf32>
    %37 = arith.mulf %35, %36 : vector<8x128xf32>
    %c0_21 = arith.constant 0 : index
    %c0_22 = arith.constant 0 : index
    %38 = vector.load %arg8[%c0_21, %c0_22] : memref<8x128xf32, #tpu.memory_space<vmem>>, vector<8x128xf32>
    tpu.vector_store %arg8[%c0_21, %c0_22], %37 {strides = array<i32>} : memref<8x128xf32, #tpu.memory_space<vmem>>, vector<8x128xf32>,
    %39 = vector.shape_cast %34 : vector<8x128xf32> to vector<1x8x128xf32>
    %40 = vector.broadcast %39 : vector<1x8x128xf32> to vector<3x8x128xf32>
    %41 = arith.mulf %40, %8 : vector<3x8x128xf32>
    %c0_23 = arith.constant 0 : index
    %c0_24 = arith.constant 0 : index
    %c0_25 = arith.constant 0 : index
    %42 = vector.load %arg9[%c0_23, %c0_24, %c0_25] : memref<3x8x128xf32, #tpu.memory_space<vmem>>, vector<3x8x128xf32>
    tpu.vector_store %arg9[%c0_23, %c0_24, %c0_25], %41 {strides = array<i32>} : memref<3x8x128xf32, #tpu.memory_space<vmem>>, vector<3x8x128xf32>,
    return
  }
  func.func @transform_0(%arg0: i32) -> (i32, i32) {
    %c0_i32 = arith.constant 0 : i32
    %c0_i32_0 = arith.constant 0 : i32
    return %arg0, %c0_i32 : i32, i32
  }
  func.func @transform_1(%arg0: i32) -> (i32, i32, i32) {
    %c0_i32 = arith.constant 0 : i32
    %c0_i32_0 = arith.constant 0 : i32
    %c0_i32_1 = arith.constant 0 : i32
    return %c0_i32, %arg0, %c0_i32_0 : i32, i32, i32
  }
  func.func @transform_2(%arg0: i32) -> (i32, i32) {
    %c0_i32 = arith.constant 0 : i32
    %c0_i32_0 = arith.constant 0 : i32
    %c0_i32_1 = arith.constant 0 : i32
    return %c0_i32, %c0_i32_0 : i32, i32
  }
  func.func @transform_3(%arg0: i32) -> (i32, i32) {
    %c0_i32 = arith.constant 0 : i32
    %c0_i32_0 = arith.constant 0 : i32
    %c0_i32_1 = arith.constant 0 : i32
    return %c0_i32, %c0_i32_0 : i32, i32
  }
  func.func @transform_4(%arg0: i32) -> (i32, i32) {
    %c0_i32 = arith.constant 0 : i32
    %c0_i32_0 = arith.constant 0 : i32
    %c0_i32_1 = arith.constant 0 : i32
    return %c0_i32, %c0_i32_0 : i32, i32
  }
  func.func @transform_5(%arg0: i32) -> (i32, i32) {
    %c0_i32 = arith.constant 0 : i32
    %c0_i32_0 = arith.constant 0 : i32
    %c0_i32_1 = arith.constant 0 : i32
    return %c0_i32, %c0_i32_0 : i32, i32
  }
  func.func @transform_6(%arg0: i32) -> (i32, i32) {
    %c0_i32 = arith.constant 0 : i32
    %c0_i32_0 = arith.constant 0 : i32
    %c0_i32_1 = arith.constant 0 : i32
    return %c0_i32, %c0_i32_0 : i32, i32
  }
  func.func @transform_7(%arg0: i32) -> (i32, i32) {
    %c0_i32 = arith.constant 0 : i32
    %c0_i32_0 = arith.constant 0 : i32
    return %arg0, %c0_i32 : i32, i32
  }
  func.func @transform_8(%arg0: i32) -> (i32, i32, i32) {
    %c0_i32 = arith.constant 0 : i32
    %c0_i32_0 = arith.constant 0 : i32
    %c0_i32_1 = arith.constant 0 : i32
    return %c0_i32, %arg0, %c0_i32_0 : i32, i32, i32
  }
}

</mosaic_0001>

<bundles_post_ra>
// kernel: tpu_custom_call.1
= control target key start
LH: loop header
LB: loop body
LE: loop exit
PB: predicated region body
PF: predicated region fallthrough
CT: control target
= control target key end

     0   :  { %s5213_s0 = inlined_call_operand.hbm [shape: f32[16,128], index: 0, kind: input, shape index: {}]   ;;  %s5214_s1 = inlined_call_operand.hbm [shape: f32[3,16,128], index: 1, kind: input, shape index: {}]   ;;  %s5215_s2 = inlined_call_operand.hbm [shape: f32[128,256], index: 2, kind: input, shape index: {}]   ;;  %s5216_s3 = inlined_call_operand.hbm [shape: f32[256,128], index: 3, kind: input, shape index: {}]   ;;  %s5217_s4 = inlined_call_operand.vmem [shape: f32[1,128], index: 4, kind: input, shape index: {}]   ;;  %s5218_s5 = inlined_call_operand.hbm [shape: f32[128,256], index: 5, kind: input, shape index: {}]   ;;  %s5219_s6 = inlined_call_operand.vmem [shape: f32[1,256], index: 6, kind: input, shape index: {}]   ;;  %s5220_s7 = inlined_call_operand.hbm [shape: f32[16,128], index: 7, kind: output, shape index: {0}]   ;;  %s5221_s8 = inlined_call_operand.hbm [shape: f32[3,16,128], index: 8, kind: output, shape index: {1}]  }
   0x1   :  { %5271 = sst [smem:[#allocation30_spill]] %s5215_s2 }
   0x2   :  { %5272 = sst [smem:[#allocation31_spill]] %s5216_s3 }
   0x3   :  { %5273 = sst [smem:[#allocation32_spill]] %s5218_s5 }
   0x4   :  { %14 = vsyncpa [#allocation3], 0 }
   0x5   :  { %16 = vsyncpa [#allocation3 + $0x1], 0 }
   0x6   :  { %17 = vsyncpa [#allocation6], 0 }
   0x7   :  { %19 = vsyncpa [#allocation6 + $0x1], 0 }
   0x8   :  { %20 = vsyncpa [#allocation9], 0 }
   0x9   :  { %21 = vsyncpa [#allocation4], 0 }
   0xa   :  { %23 = vsyncpa [#allocation4 + $0x1], 0 }
   0xb   :  { %24 = vsyncpa [#allocation13], 0 }
   0xc   :  { %26 = vsyncpa [#allocation13 + $0x1], 0  ;;  %s3388_s27 = smov 0   ;;  %s3390_s28 = smov 0  }
   0xd   :  { %s3392_s29 = smov 0   ;;  %s3394_s30 = smov 0  }
   0xe LB: > { %5274 = sst [smem:[#allocation20_spill]] %s3327_s29  ;;  %s3412_s12 = sadd.s32 4294967295, %s3331_s30   ;;  %s3331_s30 = sphi %s3394_s30, %s5344_s30   ;;  %s3327_s29 = sphi %s3392_s29, %s5346_s29   ;;  %s3323_s28 = sphi %s3390_s28, %s5348_s28   ;;  %s3319_s27 = sphi %s3388_s27, %s5347_s27  }
   0xf   : > { %s5275_s2 = sld [smem:[#allocation30_spill]]  ;;  %p2948_p0 = scmp.ge.s32.totalorder %s3331_s30, 1 }
  0x10   : > { %p53_p1 = scmp.eq.s32.totalorder %s3412_s12, 0  ;;  %p246_p2 = scmp.lt.s32.totalorder %s3331_s30, 3 }
  0x11   : > { %s3333_s14 = smov [#allocation7]   ;;  %s5277_s3 = sld [smem:[#allocation31_spill]] }
  0x12   : > { %p3417_p3 = pnand %p2948_p0, %p246_p2  ;;  %s259_s15 = sshll.u32 %s3333_s14, 4  ;;  %s260_s15 = int_to_ptr.vmem [resolvable:$true] %s259_s15 }
  0x13   : > { %s3334_s20 = smov [#allocation8]   ;;  %s5222_s22 = smov 256  }
  0x14   : > { %p2990_p4 = pneg %p3417_p3  ;;  %s273_s21 = sshll.u32 %s3334_s20, 4  ;;  %s274_s21 = int_to_ptr.vmem [resolvable:$true] %s273_s21 }
  0x15   : > { %s257_s11 = sshll.u32 %s5275_s2, 4  ;;  %s3336_s23 = smov 16   ;;  %s258_s11 = int_to_ptr.hbm [resolvable:$true] %s257_s11 }
  0x16   : > { %p3429_p6 = pnand %p2990_p4, %p53_p1  ;;  %s5223_s24 = smov 128  }
  0x17   : > { %s271_s18 = sshll.u32 %s5277_s3, 4  ;;  %s5224_s25 = smov 8   ;;  %s272_s18 = int_to_ptr.hbm [resolvable:$true] %s271_s18 }
  0x18   : > { %2993 = dma.hbm_to_vmem [thread:$0]  (!%p3429_p6), %s258_s11, 4096, %s260_s15, [#allocation6], %s5222_s22, %s5222_s22, %s3336_s23  }
  0x19   : > { %2996 = dma.hbm_to_vmem [thread:$0]  (!%p3429_p6), %s272_s18, 4096, %s274_s21, [#allocation9], %s5223_s24, %s5223_s24, %s5224_s25  }
  0x1a   : > { %s5279_s5 = sld [smem:[#allocation32_spill]]  ;;  %s3339_s11 = smov [#allocation10]  }
  0x1b   : > { %s290_s14 = sshll.u32 %s3339_s11, 4  ;;  %s2947_s15 = sadd.s32 4294967294, %s3331_s30   ;;  %s291_s14 = int_to_ptr.vmem [resolvable:$true] %s290_s14 }
  0x1c   : > { %s3451_s16 = sadd.s32 1, %s3331_s30   ;;  %s39_s17 = sadd.s32 1, %s3327_s29 }
  0x1d   : > { %5280 = sst [smem:[#allocation21_spill]] %s3451_s16  ;;  %s36_s18 = ssub.s32 %s3331_s30, %s3451_s16 }
  0x1e   : > { %p46_p7 = scmp.ne.s32.totalorder %s3327_s29, %s3323_s28  ;;  %p37_p8 = scmp.eq.s32.totalorder %s36_s18, 0 }
  0x1f   : > { %p47_p9 = scmp.eq.s32.totalorder %s3331_s30, 0  ;;  %p52_p10 = scmp.ne.s32.totalorder %s3323_s28, %s3319_s27 }
  0x20   : > { %s288_s10 = sshll.u32 %s5279_s5, 4  ;;  %p207_p11 = scmp.eq.s32.totalorder %s3412_s12, 1  ;;  %s289_s10 = int_to_ptr.hbm [resolvable:$true] %s288_s10 }
  0x21   : > { %2999 = dma.hbm_to_vmem [thread:$0]  (!%p3429_p6), %s289_s10, 4096, %s291_s14, [#allocation9], %s5222_s22, %s5222_s22, %s3336_s23  }
  0x22   : > { %s3463_s20 = scalar_select %p37_p8, %s3327_s29, %s39_s17  }
  0x23   : > { %p3465_p12 = por %p47_p9, %p46_p7  ;;  %p3471_p13 = por %p53_p1, %p52_p10 }
  0x24   : > { %5281 = sst [smem:[#allocation22_spill]] %s3463_s20  ;;  %p3475_p0 = por %p207_p11, %p46_p7 }
  0x25   : > { %p213_p2 = scmp.eq.s32.totalorder %s2947_s15, 1  ;;  %p3017_p4 = scmp.lt.s32.totalorder %s3331_s30, 2 }
  0x26   : > { %s3481_s26 = sand.u32 1, %s3327_s29   ;;  %s2954_s11 = sshll.u32 %s3331_s30, 3 }
  0x27   : > { %p3483_p6 = por %p213_p2, %p52_p10  ;;  %s2953_s10 = sshll.u32 %s3481_s26, 3 }
  0x28   : > { %s315_s18 = scalar_lea.hbm %s5213_s0, %s2954_s11  ;;  %s311_s24 = scalar_lea.vmem [#allocation2], %s2953_s10 }
  0x29   : > { %s5285_s9 = scalar_select %p3483_p6, 1, 0 }
  0x2a   : > { %s317_s22 = sshll.u32 %s315_s18, 4  ;;  %s319_s25 = sshll.u32 %s311_s24, 4  ;;  %s318_s22 = int_to_ptr.hbm [resolvable:$true] %s317_s22  ;;  %s320_s25 = int_to_ptr.vmem [resolvable:$true] %s319_s25 }
  0x2b   : > { %5286 = sst [smem:[#allocation23_spill]] %s5285_s9  ;;  %p3494_p7 = pnand %p3017_p4, %p3465_p12 }
  0x2c   : > { %s2968_s2 = smul.u32 24, %s3481_s26  ;;  %s334_s20 = scalar_lea.hbm %s5214_s1, %s2954_s11 }
  0x2d   : > { %s326_s29 = sand.u32 1, %s3331_s30   ;;  %s308_s14 = scalar_lea.sflag [#allocation3], %s3481_s26 }
  0x2e   : > { %s3161_s17 = sshra.s32 %s318_s22, 4  ;;  %p3165_p9 = pneg %p3494_p7  ;;  %s3162_s17 = int_to_ptr.hbm [resolvable:$true] %s3161_s17 }
  0x2f   : > { %s3163_s10 = scalar_lea.hbm %s3162_s17, 8  ;;  %s3168_s18 = scalar_lea.hbm %s5213_s0, 16 }
  0x30   : > { %p3164_p8 = scmp.ne.s32.totalorder %s3162_s17, %s3163_s10  ;;  %p3169_p12 = scmp.lt.s32.totalorder %s3162_s17, %s5213_s0 }
  0x31   : > { %p3170_p2 = scmp.lt.s32.totalorder %s3168_s18, %s3163_s10 }
  0x32   : > { %p3166_p10 = pnand %p3165_p9, %p3164_p8 }
  0x33   : > { %p3171_p4 = por %p3170_p2, %p3169_p12 }
  0x34   : > { %p3167_p11 = pneg %p3166_p10 }
  0x36   : > { %p3172_p5 = pnand %p3171_p4, %p3167_p11 }
  0x38   : > { %3175 = shalt.err (!%p3172_p5)
}
  0x39   : > { %3003 = dma.hbm_to_vmem [thread:$0]  (!%p3494_p7), %s318_s22, 128, %s320_s25, %s308_s14  }
  0x3a   : > { %s335_s3 = sshll.u32 %s334_s20, 4  ;;  %s330_s5 = scalar_lea.vmem [#allocation5], %s2968_s2  ;;  %s336_s3 = int_to_ptr.hbm [resolvable:$true] %s335_s3 }
  0x3b   : > { %s337_s26 = sshll.u32 %s330_s5, 4  ;;  %s327_s11 = scalar_lea.sflag [#allocation6], %s326_s29  ;;  %s338_s26 = int_to_ptr.vmem [resolvable:$true] %s337_s26 }
  0x3c   : > { %s3191_s24 = sshra.s32 %s336_s3, 4  ;;  %s3198_s17 = scalar_lea.hbm %s5214_s1, 48  ;;  %s3192_s24 = int_to_ptr.hbm [resolvable:$true] %s3191_s24 }
  0x3d   : > { %s3193_s19 = scalar_lea.hbm %s3192_s24, 24  ;;  %p3199_p5 = scmp.lt.s32.totalorder %s3192_s24, %s5214_s1 }
  0x3e   : > { %p3194_p8 = scmp.ne.s32.totalorder %s3192_s24, %s3193_s19  ;;  %p3200_p11 = scmp.lt.s32.totalorder %s3198_s17, %s3193_s19 }
  0x40   : > { %p3196_p10 = pnand %p3194_p8, %p3165_p9  ;;  %p3201_p2 = por %p3200_p11, %p3199_p5 }
  0x42   : > { %p3197_p12 = pneg %p3196_p10 }
  0x44   : > { %p3202_p4 = pnand %p3201_p2, %p3197_p12 }
  0x46   : > { %3205 = shalt.err (!%p3202_p4)
}
  0x47   : > { %s5288_s2 = smov 8   ;;  %s5289_s29 = smov 128  }
  0x48   : > { %s5290_s25 = smov 256   ;;  %349 = sbr.rel (%p3417_p3) target bundleno = 711 (0x2c7), region = 48 }
  0x49   : > { %3006 = dma.hbm_to_vmem [thread:$0]  (!%p3494_p7), %s336_s3, 384, %s338_s26, %s327_s11, %s5290_s25, %s5289_s29, %s5288_s2  }
  0x4d   : > { %s3534_s20 = sand.u32 1, %s3323_s28  }
  0x4e   : > { %s2957_s14 = sshll.u32 %s3534_s20, 3  ;;  %s352_s18 = scalar_lea.sflag [#allocation3], %s3534_s20 }
  0x4f   : > { %s3540_s5 = scalar_lea.vmem [#allocation2], %s2957_s14 }
  0x50   : > { %3294 = dma.done.wait (%p3471_p13), %s352_s18, 128  }
  0x51   : > { %3296 = vsyncadd (%p3471_p13), %s352_s18, 4294967168  ;;  %s361_s13 = sand.u32 1, %s3412_s12   ;;  %s2969_s15 = smul.u32 24, %s3534_s20 }
  0x52   : > { %s362_s3 = scalar_lea.sflag [#allocation6], %s361_s13 }
  0x53   : > { %s3550_s26 = scalar_lea.vmem [#allocation5], %s2969_s15 }
  0x54   : > { %3298 = dma.done.wait (%p3471_p13), %s362_s3, 384  }
  0x55   : > { %3300 = vsyncadd (%p3471_p13), %s362_s3, 4294966912 }
  0x56   : > { %3302 = dma.done.wait (%p53_p1), [#allocation6], 4096  }
  0x57   : > { %3304 = vsyncadd (%p53_p1), [#allocation6], 4294963200 }
  0x58   : > { %3306 = dma.done.wait (%p53_p1), [#allocation9], 8192  }
  0x59   : > { %3308 = vsyncadd (%p53_p1), [#allocation9], 4294959104  ;;  %v458_v0 = vld [vmem:[#allocation7 + $0xf0] sm:$0xff]  ;;  %v456_v1 = vld [vmem:[#allocation7 + $0xe0] sm:$0xff]  ;;  %s2964_s16 = sshll.u32 %s3412_s12, 3  ;;  %s416_s22 = scalar_lea.vmem [#allocation11], %s2957_s14 }
  0x5a   : > { %v454_v2 = vld [vmem:[#allocation7 + $0xd0] sm:$0xff]  ;;  %v3564_v3 = vand.u32 4294901760, %v458_v0  ;;  %v3566_v4 = vand.u32 4294901760, %v456_v1  ;;  %v452_v6 = vld [vmem:[#allocation7 + $0xc0] sm:$0xff]  ;;  %v459_v59 = vld [vmem:[#allocation7 + $0xf8] sm:$0xff]  ;;  %s2772_s10 = scalar_lea.hbm %s5220_s7, %s2964_s16  ;;  %s2774_s2 = sshll.u32 %s416_s22, 4  ;;  %s2775_s2 = int_to_ptr.vmem [resolvable:$true] %s2774_s2 }
  0x5b   : > { %v3568_v5 = vand.u32 4294901760, %v454_v2  ;;  %v450_v7 = vld [vmem:[#allocation7 + $0xb0] sm:$0xff]  ;;  %v448_v8 = vld [vmem:[#allocation7 + $0xa0] sm:$0xff]  ;;  %v3570_v9 = vand.u32 4294901760, %v452_v6  ;;  %s2776_s29 = sshll.u32 %s2772_s10, 4  ;;  %s2757_s25 = scalar_lea.sflag [#allocation4], %s3534_s20  ;;  %s2777_s29 = int_to_ptr.hbm [resolvable:$true] %s2776_s29 }
  0x5c   : > { %v3572_v10 = vand.u32 4294901760, %v450_v7  ;;  %v3574_v11 = vand.u32 4294901760, %v448_v8  ;;  %v446_v12 = vld [vmem:[#allocation7 + $0x90] sm:$0xff]  ;;  %v444_v13 = vld [vmem:[#allocation7 + $0x80] sm:$0xff]  ;;  %461 = vmatpush.msra.mxu0 %v3564_v3  ;;  %v3578_v14 = vsub.f32 %v458_v0, %v3564_v3  ;;  %v3581_v15 = vsub.f32 %v456_v1, %v3566_v4  ;;  %691 = vmatpush.msra.mxu3 %v3564_v3  ;;  %s3235_s18 = sshra.s32 %s2777_s29, 4  ;;  %s3236_s18 = int_to_ptr.hbm [resolvable:$true] %s3235_s18 }
  0x5d   : > { %v3585_v16 = vsub.f32 %v454_v2, %v3568_v5  ;;  %v3587_v17 = vand.u32 4294901760, %v446_v12  ;;  %v442_v18 = vld [vmem:[#allocation7 + $0x70] sm:$0xff]  ;;  %v3590_v19 = vsub.f32 %v452_v6, %v3570_v9  ;;  %v3595_v21 = vand.u32 4294901760, %v444_v13  ;;  %v440_v26 = vld [vmem:[#allocation7 + $0x60] sm:$0xff]  ;;  %v457_v2 = vld [vmem:[#allocation7 + $0xe8] sm:$0xff]  ;;  %p3242_p7 = scmp.lt.s32.totalorder %s3236_s18, %s5220_s7 }
  0x5e   : > { %v3593_v20 = vsub.f32 %v450_v7, %v3572_v10  ;;  %463 = vmatpush.msra.mxu0 %v3566_v4  ;;  %628 = vmatpush.msra.mxu2 %v3578_v14  ;;  %v519_v22 = vand.u32 4294901760, %v3578_v14  ;;  %v5243_v23 = vand.u32 4294901760, %v3581_v15  ;;  %v3603_v25 = vsub.f32 %v448_v8, %v3574_v11  ;;  %v438_v36 = vld [vmem:[#allocation7 + $0x50] sm:$0xff]  ;;  %v436_v42 = vld [vmem:[#allocation7 + $0x40] sm:$0xff] }
  0x5f   : > { %v5242_v24 = vand.u32 4294901760, %v3585_v16  ;;  %693 = vmatpush.msra.mxu3 %v3566_v4  ;;  %v5240_v27 = vand.u32 4294901760, %v3590_v19  ;;  %v3607_v28 = vand.u32 4294901760, %v442_v18  ;;  %v3610_v29 = vsub.f32 %v446_v12, %v3587_v17  ;;  %v434_v49 = vld [vmem:[#allocation7 + $0x30] sm:$0xff]  ;;  %v432_v54 = vld [vmem:[#allocation7 + $0x20] sm:$0xff] }
  0x60   : > { %465 = vmatpush.msra.mxu0 %v3568_v5  ;;  %631 = vmatpush.msra.mxu2 %v3581_v15  ;;  %v520_v30 = vsub.f32 %v3578_v14, %v519_v22  ;;  %v526_v31 = vsub.f32 %v3581_v15, %v5243_v23  ;;  %v5238_v33 = vand.u32 4294901760, %v3593_v20  ;;  %v3625_v34 = vand.u32 4294901760, %v440_v26  ;;  %v430_v62 = vld [vmem:[#allocation7 + $0x10] sm:$0xff]  ;;  %v428_v7 = vld [vmem:[#allocation7] sm:$0xff]  ;;  %v445_v14 = vld [vmem:[#allocation7 + $0x88] sm:$0xff] }
  0x61   : > { %v532_v32 = vsub.f32 %v3585_v16, %v5242_v24  ;;  %695 = vmatpush.msra.mxu3 %v3568_v5  ;;  %v3628_v35 = vsub.f32 %v444_v13, %v3595_v21  ;;  %v538_v39 = vsub.f32 %v3590_v19, %v5240_v27  ;;  %v5237_v40 = vand.u32 4294901760, %v3603_v25  ;;  %v425_v12 = vld [vmem:[%s3550_s26] sm:$0xff] }
  0x62   : > { %467 = vmatpush.msra.mxu0 %v3570_v9  ;;  %v521_v37 = vand.u32 4294901760, %v520_v30  ;;  %634 = vmatpush.msra.mxu2 %v3585_v16  ;;  %v527_v38 = vand.u32 4294901760, %v526_v31  ;;  %v3638_v41 = vsub.f32 %v442_v18, %v3607_v28  ;;  %v544_v44 = vsub.f32 %v3593_v20, %v5238_v33 }
  0x63   : > { %697 = vmatpush.msra.mxu3 %v3570_v9  ;;  %v533_v43 = vand.u32 4294901760, %v532_v32  ;;  %v3644_v45 = vand.u32 4294901760, %v438_v36  ;;  %v5235_v46 = vand.u32 4294901760, %v3610_v29  ;;  %v5234_v47 = vand.u32 4294901760, %v3628_v35 }
  0x64   : > { %469 = vmatpush.msra.mxu0 %v3572_v10  ;;  %522 = vmatpush.msra.mxu1 %v521_v37  ;;  %v3651_v48 = vsub.f32 %v440_v26, %v3625_v34  ;;  %v539_v50 = vand.u32 4294901760, %v538_v39  ;;  %v550_v51 = vsub.f32 %v3603_v25, %v5237_v40  ;;  %v3657_v52 = vand.u32 4294901760, %v436_v42  ;;  %v455_v37 = vld [vmem:[#allocation7 + $0xd8] sm:$0xff] }
  0x65   : > { %637 = vmatpush.msra.mxu2 %v3590_v19  ;;  %699 = vmatpush.msra.mxu3 %v3572_v10  ;;  %v5233_v53 = vand.u32 4294901760, %v3638_v41  ;;  %v545_v55 = vand.u32 4294901760, %v544_v44  ;;  %v556_v56 = vsub.f32 %v3610_v29, %v5235_v46  ;;  %v3666_v57 = vand.u32 4294901760, %v434_v49 }
  0x66   : > { %471 = vmatpush.msra.mxu0 %v3574_v11  ;;  %528 = vmatpush.msra.mxu1 %v527_v38  ;;  %v3669_v58 = vsub.f32 %v438_v36, %v3644_v45  ;;  %v562_v60 = vsub.f32 %v3628_v35, %v5234_v47  ;;  %v5231_v61 = vand.u32 4294901760, %v3651_v48  ;;  %v551_v63 = vand.u32 4294901760, %v550_v51 }
  0x67   : > { %640 = vmatpush.msra.mxu2 %v3593_v20  ;;  %701 = vmatpush.msra.mxu3 %v3574_v11  ;;  %v3678_v0 = vand.u32 4294901760, %v432_v54  ;;  %v3681_v1 = vsub.f32 %v436_v42, %v3657_v52  ;;  %v568_v6 = vsub.f32 %v3638_v41, %v5233_v53  ;;  %v3688_v8 = vand.u32 4294901760, %v459_v59 }
  0x68   : > { %473 = vmatpush.msra.mxu0 %v3587_v17  ;;  %534 = vmatpush.msra.mxu1 %v533_v43  ;;  %v557_v13 = vand.u32 4294901760, %v556_v56  ;;  %v3692_v18 = vand.u32 4294901760, %v430_v62  ;;  %v5230_v26 = vand.u32 4294901760, %v3669_v58  ;;  %v3696_v30 = vsub.f32 %v434_v49, %v3666_v57 }
  0x69   : > { %643 = vmatpush.msra.mxu2 %v3603_v25  ;;  %703 = vmatpush.msra.mxu3 %v3587_v17  ;;  %v563_v31 = vand.u32 4294901760, %v562_v60  ;;  %v574_v32 = vsub.f32 %v3651_v48, %v5231_v61  ;;  %v3703_v36 = vand.u32 4294901760, %v457_v2  ;;  %v3706_v38 = vand.u32 4294901760, %v428_v7 }
  0x6a   : > { %475 = vmatpush.msra.mxu0 %v3595_v21  ;;  %540 = vmatpush.msra.mxu1 %v539_v50  ;;  %v5229_v39 = vand.u32 4294901760, %v3681_v1  ;;  %v3710_v42 = vsub.f32 %v432_v54, %v3678_v0  ;;  %v3712_v43 = vand.u32 4294901760, %v425_v12  ;;  %v569_v44 = vand.u32 4294901760, %v568_v6 }
  0x6b   : > { %646 = vmatpush.msra.mxu2 %v3610_v29  ;;  %705 = vmatpush.msra.mxu3 %v3595_v21  ;;  %v3717_v49 = vsub.f32 %v459_v59, %v3688_v8  ;;  %v580_v50 = vsub.f32 %v3669_v58, %v5230_v26  ;;  %v5232_v51 = vand.u32 4294901760, %v3696_v30  ;;  %v3725_v54 = vsub.f32 %v430_v62, %v3692_v18 }
  0x6c   : > { %477 = vmatpush.msra.mxu0 %v3607_v28  ;;  %546 = vmatpush.msra.mxu1 %v545_v55  ;;  %v3727_v55 = vand.u32 4294901760, %v455_v37  ;;  %v575_v56 = vand.u32 4294901760, %v574_v32  ;;  %v3732_v59 = vsub.f32 %v457_v2, %v3703_v36  ;;  %v586_v60 = vsub.f32 %v3681_v1, %v5229_v39  ;;  %v451_v39 = vld [vmem:[#allocation7 + $0xb8] sm:$0xff] }
  0x6d   : > { %649 = vmatpush.msra.mxu2 %v3628_v35  ;;  %707 = vmatpush.msra.mxu3 %v3607_v28  ;;  %v5236_v62 = vand.u32 4294901760, %v3710_v42  ;;  %v3743_v6 = vsub.f32 %v425_v12, %v3712_v43  ;;  %v5239_v2 = vand.u32 4294901760, %v3717_v49  ;;  %v5241_v32 = vand.u32 4294901760, %v3725_v54 }
  0x6e   : > { %479 = vmatpush.msra.mxu0 %v3625_v34  ;;  %552 = vmatpush.msra.mxu1 %v551_v63  ;;  %5291 = vst [vmem:[#allocation24_spill] sm:$0xff] %v3732_v59  ;;  %v3740_v63 = vsub.f32 %v428_v7, %v3706_v38  ;;  %v592_v7 = vsub.f32 %v3696_v30, %v5232_v51  ;;  %v5244_v26 = vand.u32 4294901760, %v3732_v59  ;;  %v3775_v46 = vand.u32 4294901760, %v451_v39 }
  0x6f   : > { %652 = vmatpush.msra.mxu2 %v3638_v41  ;;  %709 = vmatpush.msra.mxu3 %v3625_v34  ;;  %5292 = vst [vmem:[#allocation25_spill] sm:$0xff] %v3743_v6  ;;  %v3754_v12 = vsub.f32 %v455_v37, %v3727_v55  ;;  %v598_v51 = vsub.f32 %v3710_v42, %v5236_v62  ;;  %v3767_v37 = vand.u32 4294901760, %v3743_v6 }
  0x70   : > { %481 = vmatpush.msra.mxu0 %v3644_v45  ;;  %558 = vmatpush.msra.mxu1 %v557_v13  ;;  %v453_v13 = vld [vmem:[#allocation7 + $0xc8] sm:$0xff]  ;;  %v5245_v53 = vand.u32 4294901760, %v3740_v63  ;;  %v923_v47 = vsub.f32 %v3717_v49, %v5239_v2  ;;  %v604_v62 = vsub.f32 %v3725_v54, %v5241_v32  ;;  %v929_v2 = vsub.f32 %v3732_v59, %v5244_v26 }
  0x71   : > { %655 = vmatpush.msra.mxu2 %v3651_v48  ;;  %711 = vmatpush.msra.mxu3 %v3644_v45  ;;  %5293 = vst [vmem:[#allocation26_spill] sm:$0xff] %v3754_v12  ;;  %v3759_v61 = vand.u32 4294901760, %v453_v13  ;;  %v5248_v40 = vand.u32 4294901760, %v3754_v12  ;;  %v495_v32 = vsub.f32 %v3743_v6, %v3767_v37  ;;  %v3804_v26 = vsub.f32 %v451_v39, %v3775_v46 }
  0x72   : > { %483 = vmatpush.msra.mxu0 %v3657_v52  ;;  %564 = vmatpush.msra.mxu1 %v563_v31  ;;  %v581_v31 = vand.u32 4294901760, %v580_v50  ;;  %v587_v50 = vand.u32 4294901760, %v586_v60  ;;  %5294 = vst [vmem:[#allocation27_spill] sm:$0xff] %v3767_v37  ;;  %v593_v60 = vand.u32 4294901760, %v592_v7  ;;  %v599_v7 = vand.u32 4294901760, %v598_v51 }
  0x73   : > { %658 = vmatpush.msra.mxu2 %v3669_v58  ;;  %713 = vmatpush.msra.mxu3 %v3657_v52  ;;  %v3790_v27 = vsub.f32 %v453_v13, %v3759_v61  ;;  %v610_v24 = vsub.f32 %v3740_v63, %v5245_v53  ;;  %v924_v13 = vand.u32 4294901760, %v923_v47  ;;  %v605_v51 = vand.u32 4294901760, %v604_v62 }
  0x74   : > { %485 = vmatpush.msra.mxu0 %v3666_v57  ;;  %570 = vmatpush.msra.mxu1 %v569_v44  ;;  %v426_v44 = vld [vmem:[%s3550_s26 + $0x8] sm:$0xff]  ;;  %v930_v47 = vand.u32 4294901760, %v929_v2  ;;  %v3820_v62 = vand.u32 4294901760, %v495_v32  ;;  %v427_v2 = vld [vmem:[%s3550_s26 + $0x10] sm:$0xff]  ;;  %s3241_s26 = scalar_lea.hbm %s5220_s7, 16 }
  0x75   : > { %661 = vmatpush.msra.mxu2 %v3681_v1  ;;  %715 = vmatpush.msra.mxu3 %v3666_v57  ;;  %v3782_v33 = vand.u32 4294901760, %v426_v44  ;;  %v5251_v39 = vand.u32 4294901760, %v3790_v27 }
  0x76   : > { %487 = vmatpush.msra.mxu0 %v3678_v0  ;;  %576 = vmatpush.msra.mxu1 %v575_v56  ;;  %v449_v56 = vld [vmem:[#allocation7 + $0xa8] sm:$0xff] }
  0x77   : > { %664 = vmatpush.msra.mxu2 %v3696_v30  ;;  %717 = vmatpush.msra.mxu3 %v3678_v0  ;;  %v3798_v23 = vand.u32 4294901760, %v449_v56  ;;  %v3811_v53 = vsub.f32 %v426_v44, %v3782_v33 }
  0x78   : > { %489 = vmatpush.msra.mxu0 %v3692_v18  ;;  %582 = vmatpush.msra.mxu1 %v581_v31  ;;  %v447_v31 = vld [vmem:[#allocation7 + $0x98] sm:$0xff] }
  0x79   : > { %667 = vmatpush.msra.mxu2 %v3710_v42  ;;  %719 = vmatpush.msra.mxu3 %v3692_v18  ;;  %5295 = vst [vmem:[#allocation28_spill] sm:$0xff] %v3811_v53  ;;  %v3813_v59 = vand.u32 4294901760, %v447_v31  ;;  %v3823_v44 = vsub.f32 %v449_v56, %v3798_v23  ;;  %v3833_v32 = vand.u32 4294901760, %v3811_v53  ;;  %v5298_v56 = vand.u32 4294901760, %v3590_v19 }
  0x7a   : > { %491 = vmatpush.msra.mxu0 %v3706_v38  ;;  %588 = vmatpush.msra.mxu1 %v587_v50  ;;  %v935_v50 = vsub.f32 %v3754_v12, %v5248_v40  ;;  %v443_v40 = vld [vmem:[#allocation7 + $0x78] sm:$0xff]  ;;  %v5297_v12 = vand.u32 4294901760, %v3585_v16  ;;  %v941_v16 = vsub.f32 %v3790_v27, %v5251_v39 }
  0x7b   : > { %670 = vmatpush.msra.mxu2 %v3725_v54  ;;  %721 = vmatpush.msra.mxu3 %v3706_v38 }
  0x7c   : > { %744 = vmatpush.msrb.mxu0 %v519_v22  ;;  %594 = vmatpush.msra.mxu1 %v593_v60  ;;  %v5296_v22 = vand.u32 4294901760, %v3581_v15  ;;  %v611_v60 = vand.u32 4294901760, %v610_v24  ;;  %v5252_v15 = vand.u32 4294901760, %v3804_v26  ;;  %v3836_v24 = vsub.f32 %v447_v31, %v3813_v59 }
  0x7d   : > { %673 = vmatpush.msra.mxu2 %v3740_v63  ;;  %925 = vmatpush.msrb.mxu3 %v924_v13  ;;  %v441_v13 = vld [vmem:[#allocation7 + $0x68] sm:$0xff]  ;;  %v5299_v31 = vand.u32 4294901760, %v3593_v20 }
  0x7e   : > { %748 = vmatpush.msrb.mxu0 %v5296_v22  ;;  %600 = vmatpush.msra.mxu1 %v599_v7  ;;  %v3828_v22 = vand.u32 4294901760, %v445_v14  ;;  %v936_v7 = vand.u32 4294901760, %v935_v50  ;;  %v3847_v50 = vand.u32 4294901760, %v427_v2  ;;  %v947_v19 = vsub.f32 %v3804_v26, %v5252_v15 }
  0x7f   : > { %864 = vmatpush.msrb.mxu2 %v3688_v8  ;;  %931 = vmatpush.msrb.mxu3 %v930_v47  ;;  %v3862_v20 = vand.u32 4294901760, %v441_v13 }
  0x80   : > { %752 = vmatpush.msrb.mxu0 %v5297_v12  ;;  %606 = vmatpush.msra.mxu1 %v605_v51  ;;  %v3843_v12 = vand.u32 4294901760, %v443_v40  ;;  %v5254_v51 = vand.u32 4294901760, %v3823_v44  ;;  %v3856_v47 = vsub.f32 %v445_v14, %v3828_v22  ;;  %v3876_v15 = vsub.f32 %v427_v2, %v3847_v50 }
  0x81   : > { %866 = vmatpush.msrb.mxu2 %v3703_v36  ;;  %497 = vmatmul.f32.vlgmr.msra.gmra.mxu0 %v3820_v62  ;;  %v5303_v2 = vand.u32 4294901760, %v3836_v24 }
  0x82   : > { %756 = vmatpush.msrb.mxu0 %v5298_v56  ;;  %612 = vmatpush.msra.mxu1 %v611_v60  ;;  %5300 = vst [vmem:[#allocation29_spill] sm:$0xff] %v3856_v47  ;;  %v439_v56 = vld [vmem:[#allocation7 + $0x58] sm:$0xff]  ;;  %v503_v60 = vsub.f32 %v3811_v53, %v3833_v32  ;;  %v3868_v14 = vsub.f32 %v443_v40, %v3843_v12  ;;  %v948_v40 = vand.u32 4294901760, %v947_v19 }
  0x83   : > { %868 = vmatpush.msrb.mxu2 %v3727_v55  ;;  %937 = vmatpush.msrb.mxu3 %v936_v7  ;;  %v953_v7 = vsub.f32 %v3823_v44, %v5254_v51  ;;  %v3878_v39 = vand.u32 4294901760, %v439_v56  ;;  %v3892_v51 = vsub.f32 %v441_v13, %v3862_v20 }
  0x84   : > { %760 = vmatpush.msrb.mxu0 %v5299_v31  ;;  %819 = vmatpush.msrb.mxu1 %v3564_v3  ;;  %v5301_v3 = vand.u32 4294901760, %v3603_v25  ;;  %v942_v31 = vand.u32 4294901760, %v941_v16  ;;  %v5302_v25 = vand.u32 4294901760, %v3610_v29  ;;  %v3886_v16 = vand.u32 4294901760, %v503_v60 }
  0x85   : > { %676 = vmatmul.f32.vlgmr.msra.gmra.mxu2 %v3743_v6  ;;  %v437_v6 = vld [vmem:[#allocation7 + $0x48] sm:$0xff]  ;;  %725 = vmatmul.f32.vlgmr.msra.gmra.mxu3 %v3767_v37  ;;  %v435_v37 = vld [vmem:[#allocation7 + $0x38] sm:$0xff]  ;;  %v954_v60 = vand.u32 4294901760, %v953_v7  ;;  %v3905_v13 = vsub.f32 %v439_v56, %v3878_v39  ;;  %v5305_v56 = vand.u32 4294901760, %v3638_v41 }
  0x86   : > { %764 = vmatpush.msrb.mxu0 %v5301_v3  ;;  %821 = vmatpush.msrb.mxu1 %v3566_v4  ;;  %v5256_v4 = vand.u32 4294901760, %v3856_v47  ;;  %v959_v3 = vsub.f32 %v3836_v24, %v5303_v2  ;;  %v3896_v19 = vand.u32 4294901760, %v437_v6  ;;  %v433_v2 = vld [vmem:[#allocation7 + $0x28] sm:$0xff]  ;;  %v3911_v29 = vand.u32 4294901760, %v435_v37  ;;  %v431_v7 = vld [vmem:[#allocation7 + $0x18] sm:$0xff] }
  0x87   : > { %870 = vmatpush.msrb.mxu2 %v3759_v61  ;;  %943 = vmatpush.msrb.mxu3 %v942_v31  ;;  %v982_v41 = vand.u32 4294901760, %v3905_v13 }
  0x88   : > { %768 = vmatpush.msrb.mxu0 %v5302_v25  ;;  %823 = vmatpush.msrb.mxu1 %v3568_v5  ;;  %v5304_v5 = vand.u32 4294901760, %v3628_v35  ;;  %v3902_v25 = vand.u32 4294901760, %v3876_v15  ;;  %v965_v31 = vsub.f32 %v3856_v47, %v5256_v4  ;;  %v3923_v4 = vsub.f32 %v437_v6, %v3896_v19 }
  0x89   : > { %872 = vmatpush.msrb.mxu2 %v3775_v46  ;;  %614 = vmatmul.f32.vlgmr.msra.gmra.mxu1 %v3712_v43  ;;  %v3925_v47 = vand.u32 4294901760, %v433_v2  ;;  %v3935_v6 = vsub.f32 %v435_v37, %v3911_v29  ;;  %v3937_v35 = vand.u32 4294901760, %v431_v7 }
  0x8a   : > { %772 = vmatpush.msrb.mxu0 %v5304_v5  ;;  %825 = vmatpush.msrb.mxu1 %v3570_v9  ;;  %v960_v9 = vand.u32 4294901760, %v959_v3  ;;  %v429_v3 = vld [vmem:[#allocation7 + $0x8] sm:$0xff] }
  0x8b   : > { %874 = vmatpush.msrb.mxu2 %v3798_v23  ;;  %949 = vmatpush.msrb.mxu3 %v948_v40  ;;  %v5306_v40 = vand.u32 4294901760, %v3868_v14  ;;  %v3948_v37 = vsub.f32 %v433_v2, %v3925_v47  ;;  %v3962_v2 = vsub.f32 %v431_v7, %v3937_v35 }
  0x8c   : > { %505 = vmatmul.f32.gmra.mxu0 %v3886_v16  ;;  %827 = vmatpush.msrb.mxu1 %v3572_v10  ;;  %v511_v10 = vsub.f32 %v3876_v15, %v3902_v25 }
  0x8d   : > { %776 = vmatpush.msrb.mxu0 %v5305_v56  ;;  %876 = vmatpush.msrb.mxu2 %v3813_v59  ;;  %v971_v5 = vsub.f32 %v3868_v14, %v5306_v40  ;;  %v5307_v56 = vand.u32 4294901760, %v3651_v48  ;;  %v966_v40 = vand.u32 4294901760, %v965_v31  ;;  %v5309_v48 = vand.u32 4294901760, %v3669_v58 }
  0x8e   : > { %955 = vmatpush.msrb.mxu3 %v954_v60  ;;  %681 = vmatmul.f32.gmra.mxu2 %v3811_v53  ;;  %v5308_v60 = vand.u32 4294901760, %v3892_v51  ;;  %v3950_v31 = vand.u32 4294901760, %v429_v3  ;;  %v994_v58 = vand.u32 4294901760, %v3935_v6  ;;  %v1006_v7 = vand.u32 4294901760, %v3962_v2 }
  0x8f   : > { %780 = vmatpush.msrb.mxu0 %v5307_v56  ;;  %829 = vmatpush.msrb.mxu1 %v3574_v11  ;;  %v972_v56 = vand.u32 4294901760, %v971_v5  ;;  %v988_v11 = vand.u32 4294901760, %v3923_v4  ;;  %v5310_v5 = vand.u32 4294901760, %v3681_v1 }
  0x90   : > { %878 = vmatpush.msrb.mxu2 %v3828_v22  ;;  %961 = vmatpush.msrb.mxu3 %v960_v9  ;;  %v977_v53 = vsub.f32 %v3892_v51, %v5308_v60  ;;  %v3954_v9 = vand.u32 4294901760, %v511_v10  ;;  %v983_v60 = vsub.f32 %v3905_v13, %v982_v41 }
  0x91   : > { %731 = vmatmul.f32.gmra.mxu3 %v3833_v32  ;;  %784 = vmatpush.msrb.mxu0 %v5309_v48  ;;  %v989_v10 = vsub.f32 %v3923_v4, %v988_v11  ;;  %v3973_v48 = vsub.f32 %v429_v3, %v3950_v31  ;;  %v5312_v3 = vand.u32 4294901760, %v3710_v42 }
  0x92   : > { %831 = vmatpush.msrb.mxu1 %v3587_v17  ;;  %880 = vmatpush.msrb.mxu2 %v3843_v12  ;;  %v978_v17 = vand.u32 4294901760, %v977_v53  ;;  %v984_v1 = vand.u32 4294901760, %v983_v60  ;;  %v995_v53 = vsub.f32 %v3935_v6, %v994_v58  ;;  %v5313_v60 = vand.u32 4294901760, %v3725_v54 }
  0x93   : > { %967 = vmatpush.msrb.mxu3 %v966_v40  ;;  %618 = vmatmul.f32.gmra.mxu1 %v3782_v33  ;;  %v1000_v40 = vand.u32 4294901760, %v3948_v37  ;;  %v5314_v54 = vand.u32 4294901760, %v3740_v63  ;;  %v5316_v63 = vld [vmem:[#allocation24_spill] sm:$0xff] }
  0x94   : > { %788 = vmatpush.msrb.mxu0 %v5310_v5  ;;  %833 = vmatpush.msrb.mxu1 %v3595_v21  ;;  %v5311_v21 = vand.u32 4294901760, %v3696_v30  ;;  %v996_v5 = vand.u32 4294901760, %v995_v53 }
  0x95   : > { %882 = vmatpush.msrb.mxu2 %v3862_v20  ;;  %973 = vmatpush.msrb.mxu3 %v972_v56  ;;  %v1001_v30 = vsub.f32 %v3948_v37, %v1000_v40  ;;  %v1012_v56 = vand.u32 4294901760, %v3973_v48 }
  0x96   : > { %513 = vmatmul.f32.gmra.mxu0 %v3954_v9  ;;  %835 = vmatpush.msrb.mxu1 %v3607_v28  ;;  %v990_v28 = vand.u32 4294901760, %v989_v10 }
  0x97   : > { %792 = vmatpush.msrb.mxu0 %v5311_v21  ;;  %884 = vmatpush.msrb.mxu2 %v3878_v39  ;;  %v1002_v42 = vand.u32 4294901760, %v1001_v30  ;;  %v5329_v21 = vld [vmem:[#allocation27_spill] sm:$0xff]  ;;  %v5330_v30 = vld [vmem:[#allocation28_spill] sm:$0xff] }
  0x98   : > { %979 = vmatpush.msrb.mxu3 %v978_v17  ;;  %686 = vmatmul.f32.gmra.mxu2 %v3876_v15  ;;  %v1013_v17 = vsub.f32 %v3973_v48, %v1012_v56 }
  0x99   : > { %796 = vmatpush.msrb.mxu0 %v5312_v3  ;;  %837 = vmatpush.msrb.mxu1 %v3625_v34  ;;  %v1007_v34 = vsub.f32 %v3962_v2, %v1006_v7 }
  0x9a   : > { %886 = vmatpush.msrb.mxu2 %v3896_v19  ;;  %985 = vmatpush.msrb.mxu3 %v984_v1  ;;  %v5328_v1 = vld [vmem:[#allocation25_spill] sm:$0xff] }
  0x9b   : > { %737 = vmatmul.f32.gmra.mxu3 %v3902_v25  ;;  %800 = vmatpush.msrb.mxu0 %v5313_v60  ;;  %v1008_v10 = vand.u32 4294901760, %v1007_v34  ;;  %v1298_v60 = vld [vmem:[#allocation8 + $0x48] sm:$0xff] }
  0x9c   : > { %839 = vmatpush.msrb.mxu1 %v3644_v45  ;;  %888 = vmatpush.msrb.mxu2 %v3911_v29  ;;  %v1014_v45 = vand.u32 4294901760, %v1013_v17 }
  0x9d   : > { %991 = vmatpush.msrb.mxu3 %v990_v28  ;;  %622 = vmatmul.f32.gmra.mxu1 %v3847_v50 }
  0x9e   : > { %804 = vmatpush.msrb.mxu0 %v5314_v54  ;;  %841 = vmatpush.msrb.mxu1 %v3657_v52  ;;  %v5315_v52 = vand.u32 4294901760, %v3717_v49  ;;  %v1295_v54 = vld [vmem:[#allocation8 + $0x30] sm:$0xff] }
  0x9f   : > { %890 = vmatpush.msrb.mxu2 %v3925_v47  ;;  %997 = vmatpush.msrb.mxu3 %v996_v5 }
  0xa0   : > { %806 = vmatmul.f32.vlgmr.msrb.gmra.mxu0 %v3712_v43  ;;  %843 = vmatpush.msrb.mxu1 %v3666_v57  ;;  %v5317_v57 = vand.u32 4294901760, %v5316_v63 }
  0xa1   : > { %892 = vmatpush.msrb.mxu2 %v3937_v35  ;;  %1003 = vmatpush.msrb.mxu3 %v1002_v42  ;;  %v1296_v42 = vld [vmem:[#allocation8 + $0x38] sm:$0xff] }
  0xa2   : > { %845 = vmatpush.msrb.mxu1 %v3678_v0  ;;  %1031 = vmatpush.msra.mxu0 %v3717_v49  ;;  %v5318_v0 = vld [vmem:[#allocation26_spill] sm:$0xff]  ;;  %v5320_v49 = vand.u32 4294901760, %v3790_v27 }
  0xa3   : > { %894 = vmatpush.msrb.mxu2 %v3950_v31  ;;  %1009 = vmatpush.msrb.mxu3 %v1008_v10 }
  0xa4   : > { %847 = vmatpush.msrb.mxu1 %v3692_v18  ;;  %1034 = vmatpush.msra.mxu0 %v5316_v63  ;;  %v5319_v18 = vand.u32 4294901760, %v5318_v0 }
  0xa5   : > { %1147 = vmatpush.msra.mxu2 %v5315_v52  ;;  %1015 = vmatpush.msrb.mxu3 %v1014_v45  ;;  %v4215_v52 = vand.u32 4294901760, %v1295_v54 }
  0xa6   : > { %849 = vmatpush.msrb.mxu1 %v3706_v38  ;;  %1037 = vmatpush.msra.mxu0 %v5318_v0  ;;  %v1304_v38 = vld [vmem:[#allocation8 + $0x78] sm:$0xff] }
  0xa7   : > { %1151 = vmatpush.msra.mxu2 %v5317_v57  ;;  %1222 = vmatpush.msra.mxu3 %v3688_v8 }
  0xa8   : > { %810 = vmatmul.f32.gmra.mxu0 %v3782_v33  ;;  %851 = vmatmul.f32.vlgmr.msrb.gmra.mxu1 %v3712_v43 }
  0xa9   : > { %1094 = vmatpush.msra.mxu1 %v3688_v8  ;;  %1155 = vmatpush.msra.mxu2 %v5319_v18  ;;  %v5321_v8 = vand.u32 4294901760, %v3804_v26 }
  0xaa   : > { %1224 = vmatpush.msra.mxu3 %v3703_v36  ;;  %900 = vmatmul.f32.vlgmr.msrb.gmra.mxu2 %v3820_v62  ;;  %v4077_v62 = vand.u32 4294901760, %v1304_v38 }
  0xab   : > { %1096 = vmatpush.msra.mxu1 %v3703_v36  ;;  %1159 = vmatpush.msra.mxu2 %v5320_v49  ;;  %v5322_v36 = vand.u32 4294901760, %v3823_v44 }
  0xac   : > { %1226 = vmatpush.msra.mxu3 %v3727_v55  ;;  %1040 = vmatpush.msra.mxu0 %v3790_v27  ;;  %v5323_v27 = vand.u32 4294901760, %v3836_v24 }
  0xad   : > { %1098 = vmatpush.msra.mxu1 %v3727_v55  ;;  %1163 = vmatpush.msra.mxu2 %v5321_v8  ;;  %v1303_v55 = vld [vmem:[#allocation8 + $0x70] sm:$0xff]  ;;  %v1294_v8 = vld [vmem:[#allocation8 + $0x28] sm:$0xff] }
  0xae   : > { %1228 = vmatpush.msra.mxu3 %v3759_v61  ;;  %1043 = vmatpush.msra.mxu0 %v3804_v26 }
  0xaf   : > { %1017 = vmatmul.f32.vlgmr.msrb.gmra.mxu3 %v3712_v43  ;;  %1100 = vmatpush.msra.mxu1 %v3759_v61  ;;  %v5324_v61 = vld [vmem:[#allocation29_spill] sm:$0xff] }
  0xb0   : > { %1167 = vmatpush.msra.mxu2 %v5322_v36  ;;  %1230 = vmatpush.msra.mxu3 %v3775_v46  ;;  %v5325_v26 = vand.u32 4294901760, %v5324_v61  ;;  %v4231_v36 = vsub.f32 %v1295_v54, %v4215_v52 }
  0xb1   : > { %814 = vmatmul.f32.gmra.mxu0 %v3847_v50  ;;  %855 = vmatmul.f32.gmra.mxu1 %v3782_v33 }
  0xb2   : > { %1046 = vmatpush.msra.mxu0 %v3823_v44  ;;  %1102 = vmatpush.msra.mxu1 %v3775_v46  ;;  %v5326_v46 = vand.u32 4294901760, %v3868_v14  ;;  %v4079_v44 = vand.u32 4294901760, %v1303_v55 }
  0xb3   : > { %1171 = vmatpush.msra.mxu2 %v5323_v27  ;;  %1232 = vmatpush.msra.mxu3 %v3798_v23 }
  0xb4   : > { %1049 = vmatpush.msra.mxu0 %v3836_v24  ;;  %1104 = vmatpush.msra.mxu1 %v3798_v23  ;;  %v5327_v23 = vand.u32 4294901760, %v3892_v51  ;;  %v1301_v24 = vld [vmem:[#allocation8 + $0x60] sm:$0xff] }
  0xb5   : > { %1175 = vmatpush.msra.mxu2 %v5325_v26  ;;  %1234 = vmatpush.msra.mxu3 %v3813_v59  ;;  %v4234_v26 = vand.u32 4294901760, %v1294_v8 }
  0xb6   : > { %908 = vmatmul.f32.gmra.mxu2 %v3886_v16  ;;  %1052 = vmatpush.msra.mxu0 %v5324_v61  ;;  %v4100_v16 = vand.u32 4294901760, %v1301_v24 }
  0xb7   : > { %1106 = vmatpush.msra.mxu1 %v3813_v59  ;;  %1179 = vmatpush.msra.mxu2 %v5326_v46  ;;  %v1302_v59 = vld [vmem:[#allocation8 + $0x68] sm:$0xff]  ;;  %v1422_v46 = vand.u32 4294901760, %v4231_v36 }
  0xb8   : > { %1236 = vmatpush.msra.mxu3 %v3828_v22  ;;  %1055 = vmatpush.msra.mxu0 %v3868_v14  ;;  %v1300_v14 = vld [vmem:[#allocation8 + $0x58] sm:$0xff] }
  0xb9   : > { %1021 = vmatmul.f32.gmra.mxu3 %v3782_v33  ;;  %1108 = vmatpush.msra.mxu1 %v3828_v22  ;;  %v4081_v22 = vand.u32 4294901760, %v1302_v59 }
  0xba   : > { %1183 = vmatpush.msra.mxu2 %v5327_v23  ;;  %1238 = vmatpush.msra.mxu3 %v3843_v12  ;;  %v1293_v23 = vld [vmem:[#allocation8 + $0x20] sm:$0xff] }
  0xbb   : > { %859 = vmatmul.f32.gmra.mxu1 %v3847_v50  ;;  %1058 = vmatpush.msra.mxu0 %v3892_v51  ;;  %v4092_v51 = vsub.f32 %v1303_v55, %v4079_v44  ;;  %v4242_v55 = vsub.f32 %v1294_v8, %v4234_v26 }
  0xbc   : > { %1110 = vmatpush.msra.mxu1 %v3843_v12  ;;  %1187 = vmatpush.msra.mxu2 %v982_v41  ;;  %v4089_v12 = vsub.f32 %v1304_v38, %v4077_v62  ;;  %v4111_v41 = vand.u32 4294901760, %v1300_v14  ;;  %v4239_v38 = vand.u32 4294901760, %v1293_v23 }
  0xbd   : > { %1240 = vmatpush.msra.mxu3 %v3862_v20  ;;  %1061 = vmatpush.msra.mxu0 %v3905_v13  ;;  %v4103_v13 = vsub.f32 %v1302_v59, %v4081_v22  ;;  %v1423_v59 = vsub.f32 %v4231_v36, %v1422_v46 }
  0xbe   : > { %1112 = vmatpush.msra.mxu1 %v3862_v20  ;;  %1191 = vmatpush.msra.mxu2 %v988_v11  ;;  %v1368_v20 = vand.u32 4294901760, %v4089_v12  ;;  %v4123_v11 = vsub.f32 %v1301_v24, %v4100_v16  ;;  %v1292_v24 = vld [vmem:[#allocation8 + $0x18] sm:$0xff] }
  0xbf   : > { %1242 = vmatpush.msra.mxu3 %v3878_v39  ;;  %916 = vmatmul.f32.gmra.mxu2 %v3954_v9 }
  0xc0   : > { %1064 = vmatpush.msra.mxu0 %v3923_v4  ;;  %1114 = vmatpush.msra.mxu1 %v3878_v39  ;;  %v1299_v4 = vld [vmem:[#allocation8 + $0x50] sm:$0xff]  ;;  %v1374_v39 = vand.u32 4294901760, %v4092_v51 }
  0xc1   : > { %1195 = vmatpush.msra.mxu2 %v994_v58  ;;  %1244 = vmatpush.msra.mxu3 %v3896_v19  ;;  %v4125_v9 = vand.u32 4294901760, %v1299_v4 }
  0xc2   : > { %1025 = vmatmul.f32.gmra.mxu3 %v3847_v50  ;;  %1067 = vmatpush.msra.mxu0 %v3935_v6  ;;  %v1380_v6 = vand.u32 4294901760, %v4103_v13 }
  0xc3   : > { %1116 = vmatpush.msra.mxu1 %v3896_v19  ;;  %1199 = vmatpush.msra.mxu2 %v1000_v40  ;;  %v1369_v19 = vsub.f32 %v4089_v12, %v1368_v20  ;;  %v4147_v40 = vsub.f32 %v1299_v4, %v4125_v9  ;;  %v1428_v4 = vand.u32 4294901760, %v4242_v55 }
  0xc4   : > { %1246 = vmatpush.msra.mxu3 %v3911_v29  ;;  %1070 = vmatpush.msra.mxu0 %v3948_v37  ;;  %v4136_v37 = vsub.f32 %v1300_v14, %v4111_v41  ;;  %v1291_v14 = vld [vmem:[#allocation8 + $0x10] sm:$0xff] }
  0xc5   : > { %1118 = vmatpush.msra.mxu1 %v3911_v29  ;;  %1203 = vmatpush.msra.mxu2 %v1006_v7  ;;  %v1375_v29 = vsub.f32 %v4092_v51, %v1374_v39  ;;  %v1370_v58 = vand.u32 4294901760, %v1369_v19  ;;  %v1398_v3 = vand.u32 4294901760, %v4147_v40  ;;  %v4250_v19 = vand.u32 4294901760, %v1292_v24 }
  0xc6   : > { %1248 = vmatpush.msra.mxu3 %v3925_v47  ;;  %1073 = vmatpush.msra.mxu0 %v3962_v2  ;;  %v1386_v2 = vand.u32 4294901760, %v4123_v11 }
  0xc7   : > { %1120 = vmatpush.msra.mxu1 %v3925_v47  ;;  %1207 = vmatpush.msra.mxu2 %v1012_v56  ;;  %v1381_v47 = vsub.f32 %v4103_v13, %v1380_v6  ;;  %v1399_v28 = vsub.f32 %v4147_v40, %v1398_v3 }
  0xc8   : > { %1250 = vmatpush.msra.mxu3 %v3937_v35  ;;  %1209 = vmatmul.f32.vlgmr.msra.gmra.mxu2 %v3712_v43  ;;  %v1387_v7 = vsub.f32 %v4123_v11, %v1386_v2 }
  0xc9   : > { %1076 = vmatpush.msra.mxu0 %v3973_v48  ;;  %1122 = vmatpush.msra.mxu1 %v3937_v35  ;;  %v1376_v48 = vand.u32 4294901760, %v1375_v29  ;;  %v1392_v35 = vand.u32 4294901760, %v4136_v37  ;;  %v1382_v53 = vand.u32 4294901760, %v1381_v47  ;;  %v1400_v5 = vand.u32 4294901760, %v1399_v28 }
  0xca   : > { %1252 = vmatpush.msra.mxu3 %v3950_v31  ;;  %1079 = vmatmul.f32.vlgmr.msra.gmra.mxu0 %v5328_v1  ;;  %v4253_v29 = vsub.f32 %v1293_v23, %v4239_v38  ;;  %v4255_v47 = vand.u32 4294901760, %v1291_v14  ;;  %v1429_v1 = vsub.f32 %v4242_v55, %v1428_v4  ;;  %v1320_v23 = vld [vmem:[#allocation8 + $0xf8] sm:$0xff] }
  0xcb   : > { %1254 = vmatmul.f32.vlgmr.msra.gmra.mxu3 %v3712_v43  ;;  %1124 = vmatpush.msra.mxu1 %v3950_v31  ;;  %v1393_v43 = vsub.f32 %v4136_v37, %v1392_v35  ;;  %v1388_v31 = vand.u32 4294901760, %v1387_v7 }
  0xcc   : > { %1128 = vmatmul.f32.vlgmr.msra.gmra.mxu1 %v5329_v21  ;;  %1326 = vmatpush.msrb.mxu0 %v4077_v62  ;;  %v4265_v21 = vsub.f32 %v1292_v24, %v4250_v19  ;;  %v4275_v28 = vsub.f32 %v1291_v14, %v4255_v47 }
  0xcd   : > { %1371 = vmatpush.msrb.mxu1 %v1370_v58  ;;  %1522 = vmatpush.msrb.mxu3 %v4077_v62  ;;  %v1394_v56 = vand.u32 4294901760, %v1393_v43  ;;  %v1424_v58 = vand.u32 4294901760, %v1423_v59  ;;  %v4311_v59 = vand.u32 4294901760, %v1320_v23 }
  0xce   : > { %1328 = vmatpush.msrb.mxu0 %v4079_v44  ;;  %1469 = vmatpush.msrb.mxu2 %v4089_v12  ;;  %v1440_v43 = vand.u32 4294901760, %v4265_v21 }
  0xcf   : > { %1377 = vmatpush.msrb.mxu1 %v1376_v48  ;;  %1524 = vmatpush.msrb.mxu3 %v4079_v44  ;;  %v1434_v48 = vand.u32 4294901760, %v4253_v29  ;;  %v4320_v14 = vsub.f32 %v1320_v23, %v4311_v59  ;;  %v1314_v23 = vld [vmem:[#allocation8 + $0xc8] sm:$0xff] }
  0xd0   : > { %1213 = vmatmul.f32.gmra.mxu2 %v3782_v33  ;;  %1330 = vmatpush.msrb.mxu0 %v4081_v22 }
  0xd1   : > { %1383 = vmatpush.msrb.mxu1 %v1382_v53  ;;  %1526 = vmatpush.msrb.mxu3 %v4081_v22  ;;  %v1430_v53 = vand.u32 4294901760, %v1429_v1  ;;  %v1435_v7 = vsub.f32 %v4253_v29, %v1434_v48  ;;  %v1709_v1 = vand.u32 4294901760, %v4320_v14 }
  0xd2   : > { %1084 = vmatmul.f32.gmra.mxu0 %v5330_v30  ;;  %1472 = vmatpush.msrb.mxu2 %v4092_v51 }
  0xd3   : > { %1258 = vmatmul.f32.gmra.mxu3 %v3782_v33  ;;  %1332 = vmatpush.msrb.mxu0 %v4100_v16  ;;  %v4183_v33 = vand.u32 4294901760, %v1298_v60  ;;  %v1436_v30 = vand.u32 4294901760, %v1435_v7  ;;  %v1710_v7 = vsub.f32 %v4320_v14, %v1709_v1 }
  0xd4   : > { %1134 = vmatmul.f32.gmra.mxu1 %v3833_v32  ;;  %1528 = vmatpush.msrb.mxu3 %v4100_v16  ;;  %v1297_v32 = vld [vmem:[#allocation8 + $0x40] sm:$0xff] }
  0xd5   : > { %1334 = vmatpush.msrb.mxu0 %v4111_v41  ;;  %1389 = vmatpush.msrb.mxu1 %v1388_v31  ;;  %v4195_v34 = vsub.f32 %v1298_v60, %v4183_v33  ;;  %v4198_v17 = vand.u32 4294901760, %v1297_v32  ;;  %v1290_v31 = vld [vmem:[#allocation8 + $0x8] sm:$0xff] }
  0xd6   : > { %1530 = vmatpush.msrb.mxu3 %v4111_v41  ;;  %1475 = vmatpush.msrb.mxu2 %v4103_v13  ;;  %v4281_v60 = vand.u32 4294901760, %v1290_v31 }
  0xd7   : > { %1336 = vmatpush.msrb.mxu0 %v4125_v9  ;;  %1395 = vmatpush.msrb.mxu1 %v1394_v56  ;;  %v1441_v56 = vsub.f32 %v4265_v21, %v1440_v43 }
  0xd8   : > { %1217 = vmatmul.f32.gmra.mxu2 %v3847_v50  ;;  %1532 = vmatpush.msrb.mxu3 %v4125_v9 }
  0xd9   : > { %1338 = vmatpush.msrb.mxu0 %v4183_v33  ;;  %1401 = vmatpush.msrb.mxu1 %v1400_v5  ;;  %v1446_v5 = vand.u32 4294901760, %v4275_v28 }
  0xda   : > { %1089 = vmatmul.f32.gmra.mxu0 %v3876_v15  ;;  %1534 = vmatpush.msrb.mxu3 %v4183_v33  ;;  %v4200_v15 = vand.u32 4294901760, %v1296_v42 }
  0xdb   : > { %1262 = vmatmul.f32.gmra.mxu3 %v3847_v50  ;;  %1478 = vmatpush.msrb.mxu2 %v4123_v11  ;;  %v1404_v50 = vand.u32 4294901760, %v4195_v34 }
  0xdc   : > { %1140 = vmatmul.f32.gmra.mxu1 %v3902_v25  ;;  %1340 = vmatpush.msrb.mxu0 %v4198_v17  ;;  %v4206_v25 = vsub.f32 %v1297_v32, %v4198_v17  ;;  %v4209_v10 = vsub.f32 %v1296_v42, %v4200_v15  ;;  %v1289_v32 = vld [vmem:[#allocation8] sm:$0xff]  ;;  %v1442_v42 = vand.u32 4294901760, %v1441_v56 }
  0xdd   : > { %1481 = vmatpush.msrb.mxu2 %v4136_v37  ;;  %1536 = vmatpush.msrb.mxu3 %v4198_v17  ;;  %v1405_v45 = vsub.f32 %v4195_v34, %v1404_v50  ;;  %v4286_v54 = vand.u32 4294901760, %v1289_v32 }
  0xde   : > { %1342 = vmatpush.msrb.mxu0 %v4200_v15  ;;  %v1410_v63 = vand.u32 4294901760, %v4206_v25  ;;  %v1416_v57 = vand.u32 4294901760, %v4209_v10 }
  0xdf   : > { %1484 = vmatpush.msrb.mxu2 %v4147_v40  ;;  %1538 = vmatpush.msrb.mxu3 %v4200_v15  ;;  %v1406_v0 = vand.u32 4294901760, %v1405_v45  ;;  %v4289_v45 = vsub.f32 %v1290_v31, %v4281_v60 }
  0xe0   : > { %v1411_v18 = vsub.f32 %v4206_v25, %v1410_v63  ;;  %1344 = vmatpush.msrb.mxu0 %v4215_v52  ;;  %v1417_v49 = vsub.f32 %v4209_v10, %v1416_v57 }
  0xe1   : > { %1487 = vmatpush.msrb.mxu2 %v4195_v34  ;;  %1540 = vmatpush.msrb.mxu3 %v4215_v52 }
  0xe2   : > { %1407 = vmatpush.msrb.mxu1 %v1406_v0  ;;  %v1412_v27 = vand.u32 4294901760, %v1411_v18  ;;  %v1418_v61 = vand.u32 4294901760, %v1417_v49  ;;  %1346 = vmatpush.msrb.mxu0 %v4234_v26  ;;  %v1447_v0 = vsub.f32 %v4275_v28, %v1446_v5  ;;  %v1452_v18 = vand.u32 4294901760, %v4289_v45 }
  0xe3   : > { %1490 = vmatpush.msrb.mxu2 %v4206_v25  ;;  %1542 = vmatpush.msrb.mxu3 %v4234_v26  ;;  %v4299_v49 = vsub.f32 %v1289_v32, %v4286_v54 }
  0xe4   : > { %1413 = vmatpush.msrb.mxu1 %v1412_v27  ;;  %1348 = vmatpush.msrb.mxu0 %v4239_v38  ;;  %v1448_v8 = vand.u32 4294901760, %v1447_v0  ;;  %v1453_v27 = vsub.f32 %v4289_v45, %v1452_v18  ;;  %v1315_v0 = vld [vmem:[#allocation8 + $0xd0] sm:$0xff] }
  0xe5   : > { %1493 = vmatpush.msrb.mxu2 %v4209_v10  ;;  %1544 = vmatpush.msrb.mxu3 %v4239_v38 }
  0xe6   : > { %1419 = vmatpush.msrb.mxu1 %v1418_v61  ;;  %1350 = vmatpush.msrb.mxu0 %v4250_v19  ;;  %v1458_v61 = vand.u32 4294901760, %v4299_v49  ;;  %v1454_v24 = vand.u32 4294901760, %v1453_v27 }
  0xe7   : > { %1496 = vmatpush.msrb.mxu2 %v4231_v36  ;;  %1546 = vmatpush.msrb.mxu3 %v4250_v19 }
  0xe8   : > { %1425 = vmatpush.msrb.mxu1 %v1424_v58  ;;  %1352 = vmatpush.msrb.mxu0 %v4255_v47  ;;  %v1459_v12 = vsub.f32 %v4299_v49, %v1458_v61 }
  0xe9   : > { %1499 = vmatpush.msrb.mxu2 %v4242_v55  ;;  %1548 = vmatpush.msrb.mxu3 %v4255_v47 }
  0xea   : > { %1431 = vmatpush.msrb.mxu1 %v1430_v53  ;;  %1354 = vmatpush.msrb.mxu0 %v4281_v60  ;;  %v1460_v51 = vand.u32 4294901760, %v1459_v12 }
  0xeb   : > { %1502 = vmatpush.msrb.mxu2 %v4253_v29  ;;  %1550 = vmatpush.msrb.mxu3 %v4281_v60 }
  0xec   : > { %1437 = vmatpush.msrb.mxu1 %v1436_v30  ;;  %1356 = vmatpush.msrb.mxu0 %v4286_v54  ;;  %v1316_v30 = vld [vmem:[#allocation8 + $0xd8] sm:$0xff] }
  0xed   : > { %1505 = vmatpush.msrb.mxu2 %v4265_v21  ;;  %1552 = vmatpush.msrb.mxu3 %v4286_v54 }
  0xee   : > { %1443 = vmatpush.msrb.mxu1 %v1442_v42  ;;  %1563 = vmatpush.msra.mxu0 %v1368_v20  ;;  %v1319_v20 = vld [vmem:[#allocation8 + $0xf0] sm:$0xff]  ;;  %v4359_v42 = vand.u32 4294901760, %v1316_v30 }
  0xef   : > { %1508 = vmatpush.msrb.mxu2 %v4275_v28  ;;  %v4322_v58 = vand.u32 4294901760, %v1319_v20 }
  0xf0   : > { %1449 = vmatpush.msrb.mxu1 %v1448_v8  ;;  %1567 = vmatpush.msra.mxu0 %v1374_v39  ;;  %v1318_v39 = vld [vmem:[#allocation8 + $0xe8] sm:$0xff]  ;;  %v4367_v8 = vand.u32 4294901760, %v1315_v0  ;;  %v4372_v27 = vsub.f32 %v1316_v30, %v4359_v42 }
  0xf1   : > { %1511 = vmatpush.msrb.mxu2 %v4289_v45  ;;  %v4329_v53 = vsub.f32 %v1319_v20, %v4322_v58  ;;  %v4331_v13 = vand.u32 4294901760, %v1318_v39  ;;  %v4382_v20 = vand.u32 4294901760, %v1314_v23 }
  0xf2   : > { %1571 = vmatpush.msra.mxu0 %v1380_v6  ;;  %1455 = vmatpush.msrb.mxu1 %v1454_v24  ;;  %v1317_v6 = vld [vmem:[#allocation8 + $0xe0] sm:$0xff]  ;;  %v4380_v12 = vsub.f32 %v1315_v0, %v4367_v8  ;;  %v1733_v34 = vand.u32 4294901760, %v4372_v27 }
  0xf3   : > { %1514 = vmatpush.msrb.mxu2 %v4299_v49  ;;  %v1715_v11 = vand.u32 4294901760, %v4329_v53  ;;  %v4344_v31 = vand.u32 4294901760, %v1317_v6 }
  0xf4   : > { %1575 = vmatpush.msra.mxu0 %v1386_v2  ;;  %1461 = vmatpush.msrb.mxu1 %v1460_v51  ;;  %v4342_v2 = vsub.f32 %v1318_v39, %v4331_v13  ;;  %v1739_v51 = vand.u32 4294901760, %v4380_v12  ;;  %v4391_v39 = vsub.f32 %v1314_v23, %v4382_v20  ;;  %v1310_v23 = vld [vmem:[#allocation8 + $0xa8] sm:$0xff] }
  0xf5   : > { %1667 = vmatpush.msra.mxu2 %v4311_v59  ;;  %v1716_v56 = vsub.f32 %v4329_v53, %v1715_v11 }
  0xf6   : > { %1630 = vmatpush.msra.mxu1 %v4077_v62  ;;  %1579 = vmatpush.msra.mxu0 %v1392_v35  ;;  %v1711_v62 = vand.u32 4294901760, %v1710_v7  ;;  %v1721_v37 = vand.u32 4294901760, %v4342_v2  ;;  %v4355_v35 = vsub.f32 %v1317_v6, %v4344_v31  ;;  %v1734_v6 = vsub.f32 %v4372_v27, %v1733_v34 }
  0xf7   : > { %1669 = vmatpush.msra.mxu2 %v4322_v58  ;;  %v1740_v7 = vsub.f32 %v4380_v12, %v1739_v51  ;;  %v1745_v30 = vand.u32 4294901760, %v4391_v39 }
  0xf8   : > { %1632 = vmatpush.msra.mxu1 %v4079_v44  ;;  %1583 = vmatpush.msra.mxu0 %v1398_v3  ;;  %v1717_v44 = vand.u32 4294901760, %v1716_v56  ;;  %v1722_v40 = vsub.f32 %v4342_v2, %v1721_v37  ;;  %v1727_v3 = vand.u32 4294901760, %v4355_v35  ;;  %v1735_v10 = vand.u32 4294901760, %v1734_v6  ;;  %v1311_v56 = vld [vmem:[#allocation8 + $0xb0] sm:$0xff] }
  0xf9   : > { %1671 = vmatpush.msra.mxu2 %v4331_v13  ;;  %1712 = vmatpush.msra.mxu3 %v1711_v62  ;;  %v1746_v0 = vsub.f32 %v4391_v39, %v1745_v30 }
  0xfa   : > { %1634 = vmatpush.msra.mxu1 %v4081_v22  ;;  %1587 = vmatpush.msra.mxu0 %v1404_v50  ;;  %v1723_v22 = vand.u32 4294901760, %v1722_v40  ;;  %v1728_v24 = vsub.f32 %v4355_v35, %v1727_v3  ;;  %v1313_v50 = vld [vmem:[#allocation8 + $0xc0] sm:$0xff] }
  0xfb   : > { %1673 = vmatpush.msra.mxu2 %v4344_v31  ;;  %1718 = vmatpush.msra.mxu3 %v1717_v44  ;;  %v4398_v25 = vand.u32 4294901760, %v1313_v50 }
  0xfc   : > { %1636 = vmatpush.msra.mxu1 %v4100_v16  ;;  %1591 = vmatpush.msra.mxu0 %v1410_v63  ;;  %v1729_v16 = vand.u32 4294901760, %v1728_v24  ;;  %v1312_v63 = vld [vmem:[#allocation8 + $0xb8] sm:$0xff]  ;;  %v4432_v24 = vand.u32 4294901760, %v1310_v23 }
  0xfd   : > { %1675 = vmatpush.msra.mxu2 %v4359_v42  ;;  %1724 = vmatpush.msra.mxu3 %v1723_v22  ;;  %v4408_v62 = vand.u32 4294901760, %v1312_v63 }
  0xfe   : > { %v4357_v32 = vpop.f32.mrf.mxu0  ;;  %1638 = vmatpush.msra.mxu1 %v4111_v41  ;;  %1595 = vmatpush.msra.mxu0 %v1416_v57  ;;  %v4413_v57 = vsub.f32 %v1313_v50, %v4398_v25 }
  0xff   : > { %1677 = vmatpush.msra.mxu2 %v4367_v8  ;;  %1730 = vmatpush.msra.mxu3 %v1729_v16  ;;  %v4421_v44 = vsub.f32 %v1312_v63, %v4408_v62  ;;  %v4448_v16 = vsub.f32 %v1310_v23, %v4432_v24  ;;  %v1308_v63 = vld [vmem:[#allocation8 + $0x98] sm:$0xff] }
 0x100   : > { %1640 = vmatpush.msra.mxu1 %v4125_v9  ;;  %1599 = vmatpush.msra.mxu0 %v1422_v46  ;;  %v1741_v9 = vand.u32 4294901760, %v1740_v7  ;;  %v1751_v36 = vand.u32 4294901760, %v4413_v57  ;;  %v4428_v46 = vand.u32 4294901760, %v1311_v56 }
 0x101   : > { %1679 = vmatpush.msra.mxu2 %v4382_v20  ;;  %1736 = vmatpush.msra.mxu3 %v1735_v10  ;;  %v1757_v22 = vand.u32 4294901760, %v4421_v44  ;;  %v5260_v7 = vand.u32 4294901760, %v4448_v16 }
 0x102   : > { %1642 = vmatpush.msra.mxu1 %v4183_v33  ;;  %1603 = vmatpush.msra.mxu0 %v1428_v4  ;;  %v1747_v33 = vand.u32 4294901760, %v1746_v0  ;;  %v1752_v55 = vsub.f32 %v4413_v57, %v1751_v36  ;;  %v4441_v4 = vsub.f32 %v1311_v56, %v4428_v46  ;;  %v424_v56 = vld [vmem:[%s3540_s5] sm:$0xff]  ;;  %s3237_s5 = scalar_lea.hbm %s3236_s18, 8 }
 0x103   : > { %1681 = vmatpush.msra.mxu2 %v4398_v25  ;;  %1742 = vmatpush.msra.mxu3 %v1741_v9  ;;  %v1758_v50 = vsub.f32 %v4421_v44, %v1757_v22  ;;  %v1307_v9 = vld [vmem:[#allocation8 + $0x90] sm:$0xff]  ;;  %p3238_p1 = scmp.ne.s32.totalorder %s3236_s18, %s3237_s5  ;;  %p3243_p9 = scmp.lt.s32.totalorder %s3241_s26, %s3237_s5 }
 0x104   : > { %1644 = vmatpush.msra.mxu1 %v4198_v17  ;;  %1607 = vmatpush.msra.mxu0 %v1434_v48  ;;  %v1309_v17 = vld [vmem:[#allocation8 + $0xa0] sm:$0xff]  ;;  %v1753_v29 = vand.u32 4294901760, %v1752_v55  ;;  %v5261_v48 = vand.u32 4294901760, %v4441_v4 }
 0x105   : > { %1683 = vmatpush.msra.mxu2 %v4408_v62  ;;  %v4450_v6 = vand.u32 4294901760, %v1309_v17  ;;  %1748 = vmatpush.msra.mxu3 %v1747_v33  ;;  %v1770_v33 = vsub.f32 %v4448_v16, %v5260_v7  ;;  %p3239_p3 = pnand %p3238_p1, %p3475_p0  ;;  %p3244_p8 = por %p3243_p9, %p3242_p7 }
 0x106   : > { %v4401_v41 = vpop.f32.mrf.mxu1  ;;  %1646 = vmatpush.msra.mxu1 %v4200_v15  ;;  %1611 = vmatpush.msra.mxu0 %v1440_v43  ;;  %v1759_v15 = vand.u32 4294901760, %v1758_v50  ;;  %v1764_v21 = vsub.f32 %v4441_v4, %v5261_v48  ;;  %v4468_v43 = vand.u32 4294901760, %v1308_v63  ;;  %v1306_v50 = vld [vmem:[#allocation8 + $0x88] sm:$0xff] }
 0x107   : > { %1685 = vmatpush.msra.mxu2 %v4428_v46  ;;  %v4459_v10 = vsub.f32 %v1309_v17, %v4450_v6  ;;  %1754 = vmatpush.msra.mxu3 %v1753_v29  ;;  %v4481_v17 = vand.u32 4294901760, %v1307_v9  ;;  %v1771_v29 = vand.u32 4294901760, %v1770_v33  ;;  %p3240_p13 = pneg %p3239_p3 }
 0x108   : > { %1648 = vmatpush.msra.mxu1 %v4215_v52  ;;  %1615 = vmatpush.msra.mxu0 %v1446_v5  ;;  %v4470_v52 = vand.u32 4294901760, %v424_v56  ;;  %v4472_v0 = vpop.f32.mrf.mxu2  ;;  %v1765_v28 = vand.u32 4294901760, %v1764_v21  ;;  %v4487_v5 = vsub.f32 %v1308_v63, %v4468_v43  ;;  %v4498_v45 = vpop.f32.mrf.mxu3 }
 0x109   : > { %v4423_v40 = vpop.f32.mrf.mxu0  ;;  %1687 = vmatpush.msra.mxu2 %v4432_v24  ;;  %v5262_v55 = vand.u32 4294901760, %v4459_v10  ;;  %1760 = vmatpush.msra.mxu3 %v1759_v15  ;;  %v4495_v48 = vsub.f32 %v1307_v9, %v4481_v17  ;;  %v4505_v15 = vand.u32 4294901760, %v1306_v50  ;;  %p3245_p10 = pnand %p3244_p8, %p3240_p13 }
 0x10a   : > { %1650 = vmatpush.msra.mxu1 %v4234_v26  ;;  %1619 = vmatpush.msra.mxu0 %v1452_v18  ;;  %v1358_v26 = vsub.f32 %v424_v56, %v4470_v52  ;;  %v1305_v56 = vld [vmem:[#allocation8 + $0x80] sm:$0xff] }
 0x10b   : > { %1689 = vmatpush.msra.mxu2 %v4450_v6  ;;  %v1776_v7 = vsub.f32 %v4459_v10, %v5262_v55  ;;  %1766 = vmatpush.msra.mxu3 %v1765_v28  ;;  %v1787_v9 = vand.u32 4294901760, %v4495_v48  ;;  %v4509_v33 = vand.u32 4294901760, %v1305_v56  ;;  %v4517_v28 = vsub.f32 %v1306_v50, %v4505_v15 }
 0x10c   : > { %1652 = vmatpush.msra.mxu1 %v4239_v38  ;;  %1623 = vmatpush.msra.mxu0 %v1458_v61  ;;  %v5263_v38 = vand.u32 4294901760, %v4487_v5  ;;  %v1359_v63 = vand.u32 4294901760, %v1358_v26 }
 0x10d   : > { %1691 = vmatpush.msra.mxu2 %v4468_v43  ;;  %v1777_v21 = vand.u32 4294901760, %v1776_v7  ;;  %1772 = vmatpush.msra.mxu3 %v1771_v29  ;;  %v4524_v7 = vsub.f32 %v1305_v56, %v4509_v33 }
 0x10e   : > { %1654 = vmatpush.msra.mxu1 %v4250_v19  ;;  %v1782_v49 = vsub.f32 %v4487_v5, %v5263_v38  ;;  %v1360_v61 = vsub.f32 %v1358_v26, %v1359_v63  ;;  %v1788_v19 = vsub.f32 %v4495_v48, %v1787_v9  ;;  %1556 = vmatmul.f32.vlgmr.msrb.gmra.mxu3 %v1359_v63  ;;  %v1793_v38 = vand.u32 4294901760, %v4517_v28 }
 0x10f   : > { %1693 = vmatpush.msra.mxu2 %v4481_v17  ;;  %1463 = vmatmul.f32.vlgmr.msrb.gmra.mxu1 %v4470_v52 }
 0x110   : > { %v4474_v23 = vpop.f32.mrf.mxu1  ;;  %1656 = vmatpush.msra.mxu1 %v4255_v47  ;;  %1778 = vmatpush.msra.mxu3 %v1777_v21  ;;  %v1783_v29 = vand.u32 4294901760, %v1782_v49  ;;  %v1361_v55 = vand.u32 4294901760, %v1360_v61  ;;  %v1789_v50 = vand.u32 4294901760, %v1788_v19  ;;  %v1799_v47 = vand.u32 4294901760, %v4524_v7 }
 0x111   : > { %1695 = vmatpush.msra.mxu2 %v4505_v15  ;;  %v1794_v56 = vsub.f32 %v4517_v28, %v1793_v38  ;;  %v682_v63 = vpop.f32.mrf.mxu2 }
 0x112   : > { %1658 = vmatpush.msra.mxu1 %v4281_v60  ;;  %1517 = vmatmul.f32.vlgmr.msrb.gmra.mxu2 %v1358_v26  ;;  %v1800_v60 = vsub.f32 %v4524_v7, %v1799_v47 }
 0x113   : > { %v4500_v18 = vpop.f32.mrf.mxu0  ;;  %1784 = vmatpush.msra.mxu3 %v1783_v29  ;;  %1362 = vmatmul.f32.vlgmr.msrb.gmra.mxu0 %v1361_v55  ;;  %v1795_v26 = vand.u32 4294901760, %v1794_v56 }
 0x114   : > { %1810 = vmatpush.msrb.mxu0 %v4320_v14  ;;  %1660 = vmatpush.msra.mxu1 %v4286_v54  ;;  %v1801_v55 = vand.u32 4294901760, %v1800_v60  ;;  %v732_v49 = vpop.f32.mrf.mxu3  ;;  %v620_v14 = vadd.f32 %v4474_v23, %v4423_v40 }
 0x115   : > { %1790 = vmatpush.msra.mxu3 %v1789_v50  ;;  %1697 = vmatpush.msra.mxu2 %v4509_v33 }
 0x116   : > { %1863 = vmatpush.msrb.mxu1 %v4311_v59  ;;  %1813 = vmatpush.msrb.mxu0 %v4329_v53 }
 0x117   : > { %1796 = vmatpush.msra.mxu3 %v1795_v26  ;;  %1904 = vmatpush.msrb.mxu2 %v1709_v1 }
 0x118   : > { %1865 = vmatpush.msrb.mxu1 %v4322_v58  ;;  %1816 = vmatpush.msrb.mxu0 %v4342_v2 }
 0x119   : > { %1802 = vmatpush.msra.mxu3 %v1801_v55  ;;  %1908 = vmatpush.msrb.mxu2 %v1715_v11 }
 0x11a   : > { %v623_v21 = vpop.f32.mrf.mxu1  ;;  %1867 = vmatpush.msrb.mxu1 %v4331_v13  ;;  %1819 = vmatpush.msrb.mxu0 %v4355_v35 }
 0x11b   : > { %1971 = vmatpush.msrb.mxu3 %v4311_v59  ;;  %1912 = vmatpush.msrb.mxu2 %v1721_v37  ;;  %v687_v1 = vpop.f32.mrf.mxu2  ;;  %v616_v59 = vadd.f32 %v4401_v41, %v4357_v32  ;;  %v624_v2 = vadd.f32 %v623_v21, %v4500_v18 }
 0x11c   : > { %1869 = vmatpush.msrb.mxu1 %v4344_v31  ;;  %1822 = vmatpush.msrb.mxu0 %v4372_v27 }
 0x11d   : > { %v807_v61 = vpop.f32.mrf.mxu0  ;;  %1973 = vmatpush.msrb.mxu3 %v4322_v58  ;;  %1916 = vmatpush.msrb.mxu2 %v1727_v3  ;;  %v678_v11 = vadd.f32 %v4472_v0, %v616_v59 }
 0x11e   : > { %1871 = vmatpush.msrb.mxu1 %v4359_v42  ;;  %1825 = vmatpush.msrb.mxu0 %v4380_v12  ;;  %v738_v58 = vpop.f32.mrf.mxu3 }
 0x11f   : > { %1975 = vmatpush.msrb.mxu3 %v4331_v13  ;;  %1920 = vmatpush.msrb.mxu2 %v1733_v34  ;;  %v683_v13 = vadd.f32 %v682_v63, %v620_v14  ;;  %v727_v32 = vadd.f32 %v4498_v45, %v678_v11 }
 0x120   : > { %1873 = vmatpush.msrb.mxu1 %v4367_v8  ;;  %1828 = vmatpush.msrb.mxu0 %v4391_v39 }
 0x121   : > { %1977 = vmatpush.msrb.mxu3 %v4344_v31  ;;  %1625 = vmatmul.f32.vlgmr.msra.gmra.mxu0 %v4470_v52  ;;  %v733_v37 = vadd.f32 %v732_v49, %v683_v13  ;;  %v808_v27 = vadd.f32 %v807_v61, %v727_v32 }
 0x122   : > { %1875 = vmatpush.msrb.mxu1 %v4382_v20  ;;  %1831 = vmatpush.msrb.mxu0 %v4413_v57  ;;  %v5332_v57 = vand.u32 4294901760, %v4448_v16 }
 0x123   : > { %1979 = vmatpush.msrb.mxu3 %v4359_v42  ;;  %1924 = vmatpush.msrb.mxu2 %v1739_v51  ;;  %v688_v42 = vadd.f32 %v687_v1, %v624_v2 }
 0x124   : > { %1877 = vmatpush.msrb.mxu1 %v4398_v25  ;;  %1834 = vmatpush.msrb.mxu0 %v4421_v44 }
 0x125   : > { %v852_v54 = vpop.f32.mrf.mxu1  ;;  %v811_v53 = vpop.f32.mrf.mxu0  ;;  %1981 = vmatpush.msrb.mxu3 %v4367_v8  ;;  %1928 = vmatpush.msrb.mxu2 %v1745_v30  ;;  %v739_v51 = vadd.f32 %v738_v58, %v688_v42 }
 0x126   : > { %1879 = vmatpush.msrb.mxu1 %v4408_v62  ;;  %1837 = vmatpush.msrb.mxu0 %v4441_v4  ;;  %v812_v3 = vadd.f32 %v811_v53, %v733_v37  ;;  %v853_v39 = vadd.f32 %v852_v54, %v808_v27 }
 0x127   : > { %1983 = vmatpush.msrb.mxu3 %v4382_v20  ;;  %1932 = vmatpush.msrb.mxu2 %v1751_v36 }
 0x128   : > { %1881 = vmatpush.msrb.mxu1 %v4428_v46  ;;  %1840 = vmatpush.msrb.mxu0 %v4448_v16  ;;  %v1266_v44 = vmul.f32 %v853_v39, %v853_v39  ;;  %v5334_v16 = vand.u32 4294901760, %v4487_v5 }
 0x129   : > { %1985 = vmatpush.msrb.mxu3 %v4398_v25  ;;  %1936 = vmatpush.msrb.mxu2 %v1757_v22  ;;  %v5331_v25 = vand.u32 4294901760, %v4441_v4 }
 0x12a   : > { %1883 = vmatpush.msrb.mxu1 %v4432_v24  ;;  %1843 = vmatpush.msrb.mxu0 %v4459_v10 }
 0x12b   : > { %1987 = vmatpush.msrb.mxu3 %v4408_v62  ;;  %1662 = vmatmul.f32.vlgmr.msra.gmra.mxu1 %v4470_v52 }
 0x12c   : > { %1885 = vmatpush.msrb.mxu1 %v4450_v6  ;;  %1846 = vmatpush.msrb.mxu0 %v4487_v5 }
 0x12d   : > { %v901_v35 = vpop.f32.mrf.mxu2  ;;  %1989 = vmatpush.msrb.mxu3 %v4428_v46  ;;  %1940 = vmatpush.msrb.mxu2 %v5331_v25  ;;  %v5333_v46 = vand.u32 4294901760, %v4459_v10  ;;  %v2053_v25 = vld [vmem:[#allocation10 + $0xd0] sm:$0xff] }
 0x12e   : > { %v856_v31 = vpop.f32.mrf.mxu1  ;;  %v815_v34 = vpop.f32.mrf.mxu0  ;;  %1849 = vmatpush.msrb.mxu0 %v4495_v48  ;;  %1887 = vmatpush.msrb.mxu1 %v4468_v43 }
 0x12f   : > { %v4592_v12 = vadd.f32 %v856_v31, %v812_v3  ;;  %v816_v41 = vadd.f32 %v815_v34, %v739_v51  ;;  %1991 = vmatpush.msrb.mxu3 %v4432_v24  ;;  %1944 = vmatpush.msrb.mxu2 %v5332_v57 }
 0x130   : > { %1852 = vmatpush.msrb.mxu0 %v4517_v28  ;;  %1889 = vmatpush.msrb.mxu1 %v4481_v17 }
 0x131   : > { %v1267_v30 = vmul.f32 %v4592_v12, %v4592_v12  ;;  %1993 = vmatpush.msrb.mxu3 %v4450_v6  ;;  %1948 = vmatpush.msrb.mxu2 %v5333_v46 }
 0x132   : > { %v1018_v8 = vpop.f32.mrf.mxu3  ;;  %1855 = vmatpush.msrb.mxu0 %v4524_v7  ;;  %1891 = vmatpush.msrb.mxu1 %v4505_v15 }
 0x133   : > { %v1019_v20 = vadd.f32 %v1018_v8, %v901_v35  ;;  %v1269_v22 = vadd.f32 %v1267_v30, %v1266_v44  ;;  %1995 = vmatpush.msrb.mxu3 %v4468_v43  ;;  %1952 = vmatpush.msrb.mxu2 %v5334_v16 }
 0x134   : > { %1893 = vmatpush.msrb.mxu1 %v4509_v33 }
 0x135   : > { %1997 = vmatpush.msrb.mxu3 %v4481_v17  ;;  %1956 = vmatpush.msrb.mxu2 %v1787_v9 }
 0x137   : > { %1999 = vmatpush.msrb.mxu3 %v4505_v15  ;;  %1960 = vmatpush.msrb.mxu2 %v1793_v38 }
 0x138   : > { %v860_v62 = vpop.f32.mrf.mxu1 }
 0x139   : > { %v4611_v40 = vadd.f32 %v860_v62, %v816_v41  ;;  %v909_v36 = vpop.f32.mrf.mxu2  ;;  %2001 = vmatpush.msrb.mxu3 %v4509_v33  ;;  %1964 = vmatpush.msrb.mxu2 %v1799_v47  ;;  %v4652_v62 = vand.u32 4294901760, %v2053_v25 }
 0x13b   : > { %v1268_v24 = vmul.f32 %v4611_v40, %v4611_v40 }
 0x13c   : > { %v1022_v4 = vpop.f32.mrf.mxu3 }
 0x13d   : > { %v1270_v52 = vadd.f32 %v1269_v22, %v1268_v24  ;;  %v1023_v0 = vadd.f32 %v1022_v4, %v909_v36 }
 0x13f   : > { %3065 = vrsqrt.f32 %v1270_v52  ;;  %vm1278_vm0 = vcmp.eq.f32.partialorder %v1270_v52, inf  ;;  %v1281_v60 = vand.u32 2147483648, %v1270_v52  ;;  %vm1280_vm1 = vcmp.eq.f32.partialorder %v1270_v52, 0.0 }
 0x142   : > { %v917_v6 = vpop.f32.mrf.mxu2 }
 0x145   : > { %v3066_v10 = vpop.eup %3065  ;;  %v1026_v43 = vpop.f32.mrf.mxu3 }
 0x146   : > { %v1027_v23 = vadd.f32 %v1026_v43, %v917_v6  ;;  %v1272_v5 = vmul.f32 %v3066_v10, %v1270_v52 }
 0x147   : > { %v1080_v17 = vpop.f32.mrf.mxu0 }
 0x148   : > { %v1081_v45 = vadd.f32 %v1080_v17, %v1019_v20  ;;  %v1273_v48 = vmul.f32 %v3066_v10, %v1272_v5 }
 0x149   : > { %v1129_v18 = vpop.f32.mrf.mxu1 }
 0x14a   : > { %v1130_v9 = vadd.f32 %v1129_v18, %v1081_v45  ;;  %v1274_v19 = vmul.f32 0.5, %v1273_v48  ;;  %v2047_v45 = vld [vmem:[#allocation10 + $0xa0] sm:$0xff] }
 0x14b   : > { %v1210_v15 = vpop.f32.mrf.mxu2 }
 0x14c   : > { %v1211_v29 = vadd.f32 %v1210_v15, %v1130_v9  ;;  %v1275_v28 = vsub.f32 1.5, %v1274_v19  ;;  %v4698_v9 = vand.u32 4294901760, %v2047_v45  ;;  %v2045_v19 = vld [vmem:[#allocation10 + $0x90] sm:$0xff] }
 0x14e   : > { %v1255_v38 = vpop.f32.mrf.mxu3  ;;  %v1276_v50 = vmul.f32 %v3066_v10, %v1275_v28  ;;  %v2051_v10 = vld [vmem:[#allocation10 + $0xc0] sm:$0xff]  ;;  %v4707_v28 = vsub.f32 %v2047_v45, %v4698_v9 }
 0x14f   : > { %v4635_v56 = vadd.f32 %v1255_v38, %v1211_v29  ;;  %v1085_v33 = vpop.f32.mrf.mxu0  ;;  %v4684_v43 = vand.u32 4294901760, %v2051_v10  ;;  %v4710_v38 = vand.u32 4294901760, %v2045_v19 }
 0x150   : > { %v1086_v7 = vadd.f32 %v1085_v33, %v1023_v0  ;;  %v1277_v47 = vmul.f32 %v1276_v50, %v1270_v52  ;;  %v2043_v50 = vld [vmem:[#allocation10 + $0x80] sm:$0xff] }
 0x151   : > { %v1283_v63 = vmul.f32 %v4635_v56, %v853_v39  ;;  %v1135_v21 = vpop.f32.mrf.mxu1  ;;  %v2055_v39 = vld [vmem:[#allocation10 + $0xe0] sm:$0xff]  ;;  %v4687_v5 = vsub.f32 %v2051_v10, %v4684_v43 }
 0x152   : > { %v1136_v26 = vadd.f32 %v1135_v21, %v1086_v7  ;;  %v1279_v55 = vsel %vm1278_vm0, %v1270_v52, %v1277_v47  ;;  %v4650_v30 = vand.u32 4294901760, %v2055_v39  ;;  %v2138_v47 = vand.u32 4294901760, %v4707_v28 }
 0x153   : > { %v1214_v49 = vpop.f32.mrf.mxu2  ;;  %v1282_v61 = vsel %vm1280_vm1, %v1281_v60, %v1279_v55  ;;  %v2126_v48 = vand.u32 4294901760, %v4687_v5  ;;  %v4723_v21 = vand.u32 4294901760, %v2043_v50  ;;  %v2041_v60 = vld [vmem:[#allocation10 + $0x70] sm:$0xff] }
 0x154   : > { %v1215_v54 = vadd.f32 %v1214_v49, %v1136_v26  ;;  %v1698_v14 = vand.u32 4294901760, %v1282_v61  ;;  %v4658_v44 = vsub.f32 %v2055_v39, %v4650_v30  ;;  %v2139_v55 = vsub.f32 %v4707_v28, %v2138_v47 }
 0x155   : > { %v2127_v15 = vsub.f32 %v4687_v5, %v2126_v48 }
 0x156   : > { %v1259_v1 = vpop.f32.mrf.mxu3  ;;  %1804 = vmatmul.f32.vlgmr.msra.gmra.mxu3 %v1698_v14  ;;  %v1699_v59 = vsub.f32 %v1282_v61, %v1698_v14  ;;  %v2114_v46 = vand.u32 4294901760, %v4658_v44  ;;  %v4731_v61 = vand.u32 4294901760, %v2041_v60 }
 0x157   : > { %v4638_v58 = vadd.f32 %v1259_v1, %v1215_v54  ;;  %v1090_v53 = vpop.f32.mrf.mxu0  ;;  %v2128_v33 = vand.u32 4294901760, %v2127_v15  ;;  %v4734_v54 = vsub.f32 %v2043_v50, %v4723_v21  ;;  %v2140_v1 = vand.u32 4294901760, %v2139_v55  ;;  %v2029_v50 = vld [vmem:[#allocation10 + $0x10] sm:$0xff] }
 0x158   : > { %v1091_v13 = vadd.f32 %v1090_v53, %v1027_v23  ;;  %1858 = vmatmul.f32.vlgmr.msrb.gmra.mxu0 %v1699_v59  ;;  %v1700_v11 = vand.u32 4294901760, %v1699_v59  ;;  %v2115_v4 = vsub.f32 %v4658_v44, %v2114_v46  ;;  %v2049_v23 = vld [vmem:[#allocation10 + $0xb0] sm:$0xff]  ;;  %v4742_v53 = vsub.f32 %v2041_v60, %v4731_v61 }
 0x159   : > { %v1284_v2 = vmul.f32 %v4638_v58, %v4592_v12  ;;  %v1141_v31 = vpop.f32.mrf.mxu1  ;;  %v2057_v12 = vld [vmem:[#allocation10 + $0xf0] sm:$0xff]  ;;  %v4689_v17 = vand.u32 4294901760, %v2049_v23 }
 0x15a   : > { %v1142_v37 = vadd.f32 %v1141_v31, %v1091_v13  ;;  %1897 = vmatmul.f32.vlgmr.msrb.gmra.mxu1 %v1700_v11  ;;  %v1701_v35 = vsub.f32 %v1699_v59, %v1700_v11  ;;  %v4648_v41 = vand.u32 4294901760, %v2057_v12  ;;  %v2116_v0 = vand.u32 4294901760, %v2115_v4 }
 0x15b   : > { %v1286_v32 = vadd.f32 %v1284_v2, %v1283_v63  ;;  %v1218_v42 = vpop.f32.mrf.mxu2  ;;  %v4695_v18 = vsub.f32 %v2049_v23, %v4689_v17  ;;  %v4719_v63 = vsub.f32 %v2045_v19, %v4710_v38  ;;  %v2150_v11 = vand.u32 4294901760, %v4734_v54  ;;  %v2037_v2 = vld [vmem:[#allocation10 + $0x50] sm:$0xff] }
 0x15c   : > { %v1219_v3 = vadd.f32 %v1218_v42, %v1142_v37  ;;  %v1702_v8 = vand.u32 4294901760, %v1701_v35  ;;  %v4655_v57 = vsub.f32 %v2057_v12, %v4648_v41  ;;  %2262 = vmatpush.msra.mxu3 %v4648_v41  ;;  %2066 = vmatpush.msra.mxu0 %v4648_v41  ;;  %v2156_v37 = vand.u32 4294901760, %v4742_v53 }
 0x15d   : > { %v2132_v29 = vand.u32 4294901760, %v4695_v18  ;;  %v2144_v49 = vand.u32 4294901760, %v4719_v63  ;;  %v2151_v42 = vsub.f32 %v4734_v54, %v2150_v11 }
 0x15e   : > { %v1263_v27 = vpop.f32.mrf.mxu3  ;;  %1703 = vmatmul.f32.vlgmr.msra.gmra.mxu2 %v1702_v8  ;;  %2003 = vmatmul.f32.vlgmr.msrb.gmra.mxu3 %v1698_v14  ;;  %v2108_v36 = vand.u32 4294901760, %v4655_v57  ;;  %v2157_v8 = vsub.f32 %v4742_v53, %v2156_v37 }
 0x15f   : > { %v4642_v20 = vadd.f32 %v1263_v27, %v1219_v3  ;;  %2209 = vmatpush.msra.mxu2 %v4655_v57  ;;  %2264 = vmatpush.msra.mxu3 %v4650_v30  ;;  %v2133_v7 = vsub.f32 %v4695_v18, %v2132_v29  ;;  %v2145_v59 = vsub.f32 %v4719_v63, %v2144_v49  ;;  %v2035_v3 = vld [vmem:[#allocation10 + $0x40] sm:$0xff]  ;;  %v2152_v39 = vand.u32 4294901760, %v2151_v42 }
 0x160   : > { %2068 = vmatpush.msra.mxu0 %v4650_v30  ;;  %v2109_v24 = vsub.f32 %v4655_v57, %v2108_v36  ;;  %v4768_v12 = vand.u32 4294901760, %v2035_v3 }
 0x161   : > { %v1285_v34 = vmul.f32 %v4642_v20, %v4611_v40  ;;  %v4661_v40 = vsub.f32 %v2053_v25, %v4652_v62  ;;  %2212 = vmatpush.msra.mxu2 %v4658_v44  ;;  %2266 = vmatpush.msra.mxu3 %v4652_v62  ;;  %v2134_v26 = vand.u32 4294901760, %v2133_v7  ;;  %v2146_v31 = vand.u32 4294901760, %v2145_v59  ;;  %v2033_v25 = vld [vmem:[#allocation10 + $0x30] sm:$0xff] }
 0x162   : > { %2070 = vmatpush.msra.mxu0 %v4652_v62  ;;  %v2110_v52 = vand.u32 4294901760, %v2109_v24  ;;  %v2158_v24 = vand.u32 4294901760, %v2157_v8 }
 0x163   : > { %v4646_v51 = vadd.f32 %v1286_v32, %v1285_v34  ;;  %v2120_v22 = vand.u32 4294901760, %v4661_v40  ;;  %2215 = vmatpush.msra.mxu2 %v4661_v40  ;;  %2268 = vmatpush.msra.mxu3 %v4684_v43  ;;  %v4753_v32 = vand.u32 4294901760, %v2037_v2 }
 0x164   : > { %2111 = vmatpush.msra.mxu1 %v2110_v52  ;;  %2072 = vmatpush.msra.mxu0 %v4684_v43  ;;  %v4778_v52 = vsub.f32 %v2035_v3, %v4768_v12 }
 0x165   : > { %v2121_v16 = vsub.f32 %v4661_v40, %v2120_v22  ;;  %2218 = vmatpush.msra.mxu2 %v4687_v5  ;;  %2270 = vmatpush.msra.mxu3 %v4689_v17  ;;  %v4766_v34 = vsub.f32 %v2037_v2, %v4753_v32 }
 0x166   : > { %1966 = vmatmul.f32.vlgmr.msrb.gmra.mxu2 %v1698_v14  ;;  %2117 = vmatpush.msra.mxu1 %v2116_v0  ;;  %v2039_v14 = vld [vmem:[#allocation10 + $0x60] sm:$0xff]  ;;  %v4782_v0 = vand.u32 4294901760, %v2033_v25  ;;  %v2174_v45 = vand.u32 4294901760, %v4778_v52 }
 0x167   : > { %v2122_v6 = vand.u32 4294901760, %v2121_v16  ;;  %2074 = vmatpush.msra.mxu0 %v4689_v17  ;;  %2221 = vmatpush.msra.mxu2 %v4695_v18  ;;  %v4744_v13 = vand.u32 4294901760, %v2039_v14  ;;  %v2168_v16 = vand.u32 4294901760, %v4766_v34  ;;  %v2046_v18 = vld [vmem:[#allocation10 + $0x98] sm:$0xff] }
 0x168   : > { %2272 = vmatpush.msra.mxu3 %v4698_v9  ;;  %v4793_v15 = vsub.f32 %v2033_v25, %v4782_v0  ;;  %v2175_v7 = vsub.f32 %v4778_v52, %v2174_v45 }
 0x169   : > { %2123 = vmatpush.msra.mxu1 %v2122_v6  ;;  %2076 = vmatpush.msra.mxu0 %v4698_v9  ;;  %v4751_v35 = vsub.f32 %v2039_v14, %v4744_v13  ;;  %v2031_v6 = vld [vmem:[#allocation10 + $0x20] sm:$0xff]  ;;  %v2169_v23 = vsub.f32 %v4766_v34, %v2168_v16 }
 0x16a   : > { %2224 = vmatpush.msra.mxu2 %v4707_v28  ;;  %2274 = vmatpush.msra.mxu3 %v4710_v38  ;;  %v4788_v19 = vand.u32 4294901760, %v2031_v6  ;;  %v2180_v55 = vand.u32 4294901760, %v4793_v15  ;;  %v2027_v14 = vld [vmem:[#allocation10] sm:$0xff]  ;;  %v2176_v59 = vand.u32 4294901760, %v2175_v7  ;;  %v2044_v28 = vld [vmem:[#allocation10 + $0x88] sm:$0xff] }
 0x16b   : > { %2078 = vmatpush.msra.mxu0 %v4710_v38  ;;  %2129 = vmatpush.msra.mxu1 %v2128_v33  ;;  %v2162_v27 = vand.u32 4294901760, %v4751_v35  ;;  %v2170_v33 = vand.u32 4294901760, %v2169_v23  ;;  %v4815_v42 = vand.u32 4294901760, %v2027_v14 }
 0x16c   : > { %2227 = vmatpush.msra.mxu2 %v4719_v63  ;;  %2276 = vmatpush.msra.mxu3 %v4723_v21  ;;  %v4800_v60 = vsub.f32 %v2031_v6, %v4788_v19  ;;  %v2181_v8 = vsub.f32 %v4793_v15, %v2180_v55  ;;  %v2042_v63 = vld [vmem:[#allocation10 + $0x78] sm:$0xff] }
 0x16d   : > { %2080 = vmatpush.msra.mxu0 %v4723_v21  ;;  %2135 = vmatpush.msra.mxu1 %v2134_v26  ;;  %v2163_v4 = vsub.f32 %v4751_v35, %v2162_v27  ;;  %v4802_v26 = vand.u32 4294901760, %v2029_v50 }
 0x16e   : > { %2230 = vmatpush.msra.mxu2 %v4734_v54  ;;  %2278 = vmatpush.msra.mxu3 %v4731_v61  ;;  %v5265_v2 = vand.u32 4294901760, %v4800_v60  ;;  %v2040_v54 = vld [vmem:[#allocation10 + $0x68] sm:$0xff] }
 0x16f   : > { %2141 = vmatpush.msra.mxu1 %v2140_v1  ;;  %2082 = vmatpush.msra.mxu0 %v4731_v61  ;;  %v2164_v10 = vand.u32 4294901760, %v2163_v4  ;;  %v3064_v1 = vld [vmem:[%s5217_s4] ss:$0 sm:$0xff]  ;;  %v2182_v4 = vand.u32 4294901760, %v2181_v8 }
 0x170   : > { %2233 = vmatpush.msra.mxu2 %v4742_v53  ;;  %2280 = vmatpush.msra.mxu3 %v4744_v13 }
 0x171   : > { %2147 = vmatpush.msra.mxu1 %v2146_v31  ;;  %2084 = vmatpush.msra.mxu0 %v4744_v13  ;;  %v4813_v31 = vsub.f32 %v2029_v50, %v4802_v26 }
 0x172   : > { %2236 = vmatpush.msra.mxu2 %v4751_v35  ;;  %2282 = vmatpush.msra.mxu3 %v4753_v32 }
 0x173   : > { %2086 = vmatpush.msra.mxu0 %v4753_v32  ;;  %2153 = vmatpush.msra.mxu1 %v2152_v39  ;;  %v2187_v39 = vsub.f32 %v4800_v60, %v5265_v2  ;;  %v5264_v25 = vand.u32 4294901760, %v4813_v31  ;;  %v2054_v2 = vld [vmem:[#allocation10 + $0xd8] sm:$0xff] }
 0x174   : > { %2239 = vmatpush.msra.mxu2 %v4766_v34  ;;  %2284 = vmatpush.msra.mxu3 %v4768_v12 }
 0x175   : > { %2088 = vmatpush.msra.mxu0 %v4768_v12  ;;  %2159 = vmatpush.msra.mxu1 %v2158_v24  ;;  %v4828_v24 = vsub.f32 %v2027_v14, %v4815_v42  ;;  %v2193_v23 = vsub.f32 %v4813_v31, %v5264_v25 }
 0x176   : > { %2242 = vmatpush.msra.mxu2 %v4778_v52  ;;  %2286 = vmatpush.msra.mxu3 %v4782_v0 }
 0x177   : > { %2090 = vmatpush.msra.mxu0 %v4782_v0  ;;  %2165 = vmatpush.msra.mxu1 %v2164_v10  ;;  %v2188_v10 = vand.u32 4294901760, %v2187_v39  ;;  %v2198_v50 = vand.u32 4294901760, %v4828_v24 }
 0x178   : > { %2245 = vmatpush.msra.mxu2 %v4793_v15  ;;  %2288 = vmatpush.msra.mxu3 %v4788_v19 }
 0x179   : > { %2092 = vmatpush.msra.mxu0 %v4788_v19  ;;  %2171 = vmatpush.msra.mxu1 %v2170_v33  ;;  %v2058_v33 = vld [vmem:[#allocation10 + $0xf8] sm:$0xff] }
 0x17a   : > { %2248 = vmatpush.msra.mxu2 %v4800_v60  ;;  %2290 = vmatpush.msra.mxu3 %v4802_v26  ;;  %v4840_v14 = vand.u32 4294901760, %v2058_v33 }
 0x17b   : > { %2094 = vmatpush.msra.mxu0 %v4802_v26  ;;  %2177 = vmatpush.msra.mxu1 %v2176_v59  ;;  %v2194_v59 = vand.u32 4294901760, %v2193_v23 }
 0x17c   : > { %2251 = vmatpush.msra.mxu2 %v4813_v31  ;;  %2292 = vmatpush.msra.mxu3 %v4815_v42  ;;  %v4849_v8 = vsub.f32 %v2058_v33, %v4840_v14  ;;  %v2052_v33 = vld [vmem:[#allocation10 + $0xc8] sm:$0xff] }
 0x17d   : > { %2096 = vmatpush.msra.mxu0 %v4815_v42  ;;  %2183 = vmatpush.msra.mxu1 %v2182_v4 }
 0x17e   : > { %2254 = vmatpush.msra.mxu2 %v4828_v24  ;;  %v5266_v57 = vand.u32 4294901760, %v4849_v8 }
 0x17f   : > { %2303 = vmatpush.msrb.mxu0 %v2108_v36  ;;  %2189 = vmatpush.msra.mxu1 %v2188_v10  ;;  %v4857_v36 = vand.u32 4294901760, %v2054_v2 }
 0x180   : > { %2407 = vmatpush.msrb.mxu2 %v4840_v14  ;;  %v2450_v44 = vsub.f32 %v4849_v8, %v5266_v57 }
 0x181   : > { %2307 = vmatpush.msrb.mxu0 %v2114_v46  ;;  %2195 = vmatpush.msra.mxu1 %v2194_v59 }
 0x183   : > { %2311 = vmatpush.msrb.mxu0 %v2120_v22  ;;  %v2451_v22 = vand.u32 4294901760, %v2450_v44 }
 0x185   : > { %2315 = vmatpush.msrb.mxu0 %v2126_v48  ;;  %2452 = vmatpush.msrb.mxu3 %v2451_v22 }
 0x187   : > { %2319 = vmatpush.msrb.mxu0 %v2132_v29 }
 0x189   : > { %2323 = vmatpush.msrb.mxu0 %v2138_v47 }
 0x18b   : > { %2327 = vmatpush.msrb.mxu0 %v2144_v49 }
 0x18c   : > { %v1464_v7 = vpop.f32.mrf.mxu1 }
 0x18d   : > { %2331 = vmatpush.msrb.mxu0 %v2150_v11 }
 0x18f   : > { %2335 = vmatpush.msrb.mxu0 %v2156_v37 }
 0x190   : > { %v1363_v3 = vpop.f32.mrf.mxu0 }
 0x191   : > { %v1364_v6 = vadd.f32 %v3064_v1, %v1363_v3  ;;  %v2199_v1 = vsub.f32 %v4828_v24, %v2198_v50  ;;  %v2056_v3 = vld [vmem:[#allocation10 + $0xe8] sm:$0xff]  ;;  %v1557_v40 = vpop.f32.mrf.mxu3  ;;  %2339 = vmatpush.msrb.mxu0 %v2162_v27 }
 0x192   : > { %v4851_v39 = vand.u32 4294901760, %v2056_v3 }
 0x193   : > { %v1465_v4 = vadd.f32 %v1464_v7, %v1364_v6  ;;  %v2200_v25 = vand.u32 4294901760, %v2199_v1  ;;  %v4869_v6 = vand.u32 4294901760, %v2052_v33  ;;  %v4872_v7 = vsub.f32 %v2054_v2, %v4857_v36  ;;  %v2050_v1 = vld [vmem:[#allocation10 + $0xb8] sm:$0xff]  ;;  %v2048_v2 = vld [vmem:[#allocation10 + $0xa8] sm:$0xff]  ;;  %2343 = vmatpush.msrb.mxu0 %v2168_v16 }
 0x194   : > { %2409 = vmatpush.msrb.mxu2 %v4851_v39  ;;  %v4860_v10 = vsub.f32 %v2056_v3, %v4851_v39  ;;  %v4882_v57 = vand.u32 4294901760, %v2050_v1 }
 0x195   : > { %v1518_v23 = vpop.f32.mrf.mxu2  ;;  %2201 = vmatpush.msra.mxu1 %v2200_v25  ;;  %v2461_v3 = vand.u32 4294901760, %v4872_v7  ;;  %2347 = vmatpush.msrb.mxu0 %v2174_v45 }
 0x196   : > { %2411 = vmatpush.msrb.mxu2 %v4857_v36  ;;  %v2455_v46 = vand.u32 4294901760, %v4860_v10  ;;  %v1519_v59 = vadd.f32 %v1518_v23, %v1465_v4  ;;  %v4894_v4 = vand.u32 4294901760, %v2048_v2  ;;  %v4897_v23 = vsub.f32 %v2050_v1, %v4882_v57 }
 0x197   : > { %2370 = vmatpush.msrb.mxu1 %v4648_v41  ;;  %v4886_v41 = vsub.f32 %v2052_v33, %v4869_v6  ;;  %v2462_v48 = vsub.f32 %v4872_v7, %v2461_v3  ;;  %2351 = vmatpush.msrb.mxu0 %v2180_v55 }
 0x198   : > { %v2456_v25 = vsub.f32 %v4860_v10, %v2455_v46  ;;  %2413 = vmatpush.msrb.mxu2 %v4869_v6  ;;  %v5267_v22 = vand.u32 4294901760, %v4897_v23  ;;  %v4908_v1 = vsub.f32 %v2048_v2, %v4894_v4 }
 0x199   : > { %2372 = vmatpush.msrb.mxu1 %v4650_v30  ;;  %v1558_v30 = vadd.f32 %v1557_v40, %v1519_v59  ;;  %v2467_v33 = vand.u32 4294901760, %v4886_v41  ;;  %v2463_v44 = vand.u32 4294901760, %v2462_v48  ;;  %v4921_v40 = vand.u32 4294901760, %v2044_v28 }
 0x19a   : > { %v2457_v5 = vand.u32 4294901760, %v2456_v25  ;;  %2415 = vmatpush.msrb.mxu2 %v4882_v57  ;;  %v4905_v25 = vand.u32 4294901760, %v2046_v18  ;;  %v2474_v47 = vsub.f32 %v4897_v23, %v5267_v22  ;;  %v2479_v59 = vand.u32 4294901760, %v4908_v1 }
 0x19b   : > { %2374 = vmatpush.msrb.mxu1 %v4652_v62  ;;  %v2468_v62 = vsub.f32 %v4886_v41, %v2467_v33 }
 0x19c   : > { %2458 = vmatpush.msrb.mxu3 %v2457_v5  ;;  %2417 = vmatpush.msrb.mxu2 %v4894_v4  ;;  %v2475_v48 = vand.u32 4294901760, %v2474_v47  ;;  %v2038_v47 = vld [vmem:[#allocation10 + $0x58] sm:$0xff] }
 0x19d   : > { %2376 = vmatpush.msrb.mxu1 %v4684_v43  ;;  %v4924_v43 = vsub.f32 %v2046_v18, %v4905_v25  ;;  %v2469_v5 = vand.u32 4294901760, %v2468_v62  ;;  %v4934_v18 = vand.u32 4294901760, %v2042_v63 }
 0x19e   : > { %v1626_v29 = vpop.f32.mrf.mxu0  ;;  %2464 = vmatpush.msrb.mxu3 %v2463_v44  ;;  %2419 = vmatpush.msrb.mxu2 %v4905_v25  ;;  %v2480_v44 = vsub.f32 %v4908_v1, %v2479_v59 }
 0x19f   : > { %v1627_v2 = vadd.f32 %v1626_v29, %v1558_v30  ;;  %2378 = vmatpush.msrb.mxu1 %v4689_v17  ;;  %v5268_v22 = vand.u32 4294901760, %v4924_v43  ;;  %v4938_v17 = vsub.f32 %v2044_v28, %v4921_v40  ;;  %v4944_v29 = vand.u32 4294901760, %v2040_v54 }
 0x1a0   : > { %2421 = vmatpush.msrb.mxu2 %v4921_v40  ;;  %2470 = vmatpush.msrb.mxu3 %v2469_v5  ;;  %v2481_v11 = vand.u32 4294901760, %v2480_v44  ;;  %v4947_v62 = vsub.f32 %v2042_v63, %v4934_v18 }
 0x1a1   : > { %2380 = vmatpush.msrb.mxu1 %v4698_v9  ;;  %v2486_v30 = vsub.f32 %v4924_v43, %v5268_v22  ;;  %v2491_v28 = vand.u32 4294901760, %v4938_v17  ;;  %v4955_v22 = vand.u32 4294901760, %v2038_v47  ;;  %v4958_v63 = vsub.f32 %v2040_v54, %v4944_v29 }
 0x1a2   : > { %2423 = vmatpush.msrb.mxu2 %v4934_v18  ;;  %2476 = vmatpush.msrb.mxu3 %v2475_v48  ;;  %v5269_v44 = vand.u32 4294901760, %v4947_v62 }
 0x1a3   : > { %2382 = vmatpush.msrb.mxu1 %v4710_v38  ;;  %v2487_v5 = vand.u32 4294901760, %v2486_v30  ;;  %v2492_v38 = vsub.f32 %v4938_v17, %v2491_v28  ;;  %v2503_v35 = vand.u32 4294901760, %v4958_v63  ;;  %v4977_v54 = vsub.f32 %v2038_v47, %v4955_v22  ;;  %v2032_v47 = vld [vmem:[#allocation10 + $0x28] sm:$0xff] }
 0x1a4   : > { %2425 = vmatpush.msrb.mxu2 %v4944_v29  ;;  %2482 = vmatpush.msrb.mxu3 %v2481_v11  ;;  %v2498_v48 = vsub.f32 %v4947_v62, %v5269_v44  ;;  %v2034_v11 = vld [vmem:[#allocation10 + $0x38] sm:$0xff] }
 0x1a5   : > { %2384 = vmatpush.msrb.mxu1 %v4723_v21  ;;  %v2493_v21 = vand.u32 4294901760, %v2492_v38  ;;  %v4983_v44 = vand.u32 4294901760, %v2034_v11  ;;  %v2509_v34 = vand.u32 4294901760, %v4977_v54  ;;  %v4993_v38 = vand.u32 4294901760, %v2032_v47 }
 0x1a6   : > { %2427 = vmatpush.msrb.mxu2 %v4955_v22  ;;  %2488 = vmatpush.msrb.mxu3 %v2487_v5 }
 0x1a7   : > { %2386 = vmatpush.msrb.mxu1 %v4731_v61  ;;  %v2510_v52 = vsub.f32 %v4977_v54, %v2509_v34  ;;  %v5010_v15 = vsub.f32 %v2032_v47, %v4993_v38 }
 0x1a8   : > { %v1663_v49 = vpop.f32.mrf.mxu1  ;;  %2494 = vmatpush.msrb.mxu3 %v2493_v21 }
 0x1a9   : > { %v1664_v9 = vadd.f32 %v1663_v49, %v1627_v2  ;;  %v2036_v2 = vld [vmem:[#allocation10 + $0x48] sm:$0xff]  ;;  %2388 = vmatpush.msrb.mxu1 %v4744_v13 }
 0x1aa   : > { %v4971_v27 = vand.u32 4294901760, %v2036_v2 }
 0x1ab   : > { %2390 = vmatpush.msrb.mxu1 %v4753_v32  ;;  %v5335_v32 = vand.u32 4294901760, %v4800_v60  ;;  %v2527_v60 = vand.u32 4294901760, %v5010_v15 }
 0x1ac   : > { %2429 = vmatpush.msrb.mxu2 %v4971_v27  ;;  %v4990_v16 = vsub.f32 %v2036_v2, %v4971_v27  ;;  %v2030_v2 = vld [vmem:[#allocation10 + $0x18] sm:$0xff] }
 0x1ad   : > { %2355 = vmatpush.msrb.mxu0 %v5335_v32  ;;  %2392 = vmatpush.msrb.mxu1 %v4768_v12  ;;  %v5336_v12 = vand.u32 4294901760, %v4813_v31 }
 0x1ae   : > { %2431 = vmatpush.msrb.mxu2 %v4983_v44  ;;  %v2515_v45 = vand.u32 4294901760, %v4990_v16 }
 0x1af   : > { %2359 = vmatpush.msrb.mxu0 %v5336_v12  ;;  %2394 = vmatpush.msrb.mxu1 %v4782_v0 }
 0x1b0   : > { %2433 = vmatpush.msrb.mxu2 %v4993_v38 }
 0x1b1   : > { %2363 = vmatpush.msrb.mxu0 %v2198_v50  ;;  %2396 = vmatpush.msrb.mxu1 %v4788_v19 }
 0x1b3   : > { %2398 = vmatpush.msrb.mxu1 %v4802_v26 }
 0x1b5   : > { %2400 = vmatpush.msrb.mxu1 %v4815_v42 }
 0x1d5   : > { %v1859_v61 = vpop.f32.mrf.mxu0 }
 0x1d7   : > { %v1898_v13 = vpop.f32.mrf.mxu1 }
 0x1d9   : > { %v1805_v53 = vpop.f32.mrf.mxu3 }
 0x1e1   : > { %v1704_v37 = vpop.f32.mrf.mxu2 }
 0x1e2   : > { %v1705_v49 = vadd.f32 %v1704_v37, %v1664_v9  ;;  %v2499_v9 = vand.u32 4294901760, %v2498_v48  ;;  %v2504_v37 = vsub.f32 %v4958_v63, %v2503_v35 }
 0x1e4   : > { %v1806_v30 = vadd.f32 %v1805_v53, %v1705_v49  ;;  %v2505_v53 = vand.u32 4294901760, %v2504_v37  ;;  %v4996_v49 = vsub.f32 %v2034_v11, %v4983_v44  ;;  %2500 = vmatpush.msrb.mxu3 %v2499_v9  ;;  %v5007_v11 = vand.u32 4294901760, %v2030_v2  ;;  %v2028_v37 = vld [vmem:[#allocation10 + $0x8] sm:$0xff] }
 0x1e5   : > { %v2516_v9 = vsub.f32 %v4990_v16, %v2515_v45  ;;  %v5023_v47 = vand.u32 4294901760, %v2028_v37 }
 0x1e6   : > { %v1860_v5 = vadd.f32 %v1859_v61, %v1806_v30  ;;  %v5270_v21 = vand.u32 4294901760, %v4996_v49  ;;  %2506 = vmatpush.msrb.mxu3 %v2505_v53  ;;  %v2511_v30 = vand.u32 4294901760, %v2510_v52  ;;  %2435 = vmatpush.msrb.mxu2 %v5007_v11  ;;  %v2004_v53 = vpop.f32.mrf.mxu3  ;;  %v5029_v52 = vsub.f32 %v2030_v2, %v5007_v11 }
 0x1e8   : > { %v1899_v48 = vadd.f32 %v1898_v13, %v1860_v5  ;;  %v2522_v5 = vsub.f32 %v4996_v49, %v5270_v21  ;;  %2512 = vmatpush.msrb.mxu3 %v2511_v30  ;;  %v2517_v13 = vand.u32 4294901760, %v2516_v9  ;;  %2437 = vmatpush.msrb.mxu2 %v5023_v47  ;;  %v5036_v21 = vsub.f32 %v2028_v37, %v5023_v47 }
 0x1e9   : > { %v1967_v55 = vpop.f32.mrf.mxu2  ;;  %v2533_v0 = vand.u32 4294901760, %v5029_v52 }
 0x1ea   : > { %v1968_v61 = vadd.f32 %v1967_v55, %v1899_v48  ;;  %v2523_v32 = vand.u32 4294901760, %v2522_v5  ;;  %v2528_v55 = vsub.f32 %v5010_v15, %v2527_v60  ;;  %2518 = vmatpush.msrb.mxu3 %v2517_v13  ;;  %v2539_v30 = vand.u32 4294901760, %v5036_v21 }
 0x1eb   : > { %v2534_v9 = vsub.f32 %v5029_v52, %v2533_v0 }
 0x1ec   : > { %v2005_v48 = vadd.f32 %v2004_v53, %v1968_v61  ;;  %v2529_v2 = vand.u32 4294901760, %v2528_v55  ;;  %2524 = vmatpush.msrb.mxu3 %v2523_v32  ;;  %v2540_v24 = vsub.f32 %v5036_v21, %v2539_v30 }
 0x1ed   : > { %v2535_v19 = vand.u32 4294901760, %v2534_v9 }
 0x1ee   : > { %v2962_v31 = vmul.f32 -1.442695, %v2005_v48  ;;  %2530 = vmatpush.msrb.mxu3 %v2529_v2  ;;  %v2541_v50 = vand.u32 4294901760, %v2540_v24 }
 0x1f0   : > { %3067 = vpow2.f32 %v2962_v31  ;;  %2536 = vmatpush.msrb.mxu3 %v2535_v19 }
 0x1f2   : > { %2542 = vmatpush.msrb.mxu3 %v2541_v50 }
 0x1f6   : > { %v3068_v37 = vpop.eup %3067 }
 0x1f7   : > { %v2010_v61 = vadd.f32 1.0, %v3068_v37  ;;  %v5337_v37 = vand.u32 4294901760, %v4849_v8 }
 0x1f9   : > { %3069 = vrcp.f32 %v2010_v61  ;;  %v2022_v53 = vand.u32 2147483648, %v2010_v61  ;;  %v2020_v32 = vand.u32 2147483647, %v2010_v61  ;;  %vm2016_vm3 = vweird.f32 %v2010_v61 }
 0x1fb   : > { %v2023_v31 = vor.u32 1.1754944e-38, %v2022_v53  ;;  %vm2021_vm5 = vcmp.eq.f32.partialorder %v2020_v32, 8.507059e+37 }
 0x1ff   : > { %v3070_v26 = vpop.eup %3069 }
 0x200   : > { %v2012_v5 = vmul.f32 %v3070_v26, %v2010_v61  ;;  %vm2017_vm2 = vweird.f32 %v3070_v26 }
 0x201   : > { %vm2018_vm4 = vmor %vm2016_vm3, %vm2017_vm2 }
 0x202   : > { %v2013_v12 = vsub.f32 1.0, %v2012_v5 }
 0x204   : > { %v2014_v13 = vmul.f32 %v3070_v26, %v2013_v12 }
 0x206   : > { %v2015_v55 = vadd.f32 %v3070_v26, %v2014_v13 }
 0x208   : > { %v2019_v42 = vsel %vm2018_vm4, %v3070_v26, %v2015_v55 }
 0x209   : > { %v2024_v2 = vsel %vm2021_vm5, %v2023_v31, %v2019_v42 }
 0x20a   : > { %v2026_v9 = vmul.f32 %v2024_v2, %v2005_v48 }
 0x20c   : > { %v5051_v24 = vand.u32 4294901760, %v2026_v9 }
 0x20e   : > { %v5054_v19 = vsub.f32 %v2026_v9, %v5051_v24  ;;  %2203 = vmatmul.f32.vlgmr.msra.gmra.mxu1 %v5051_v24 }
 0x20f   : > { %2603 = vmatpush.msra.mxu1 %v4840_v14 }
 0x210   : > { %2257 = vmatmul.f32.vlgmr.msra.gmra.mxu2 %v5054_v19  ;;  %v5060_v50 = vand.u32 4294901760, %v5054_v19 }
 0x211   : > { %2605 = vmatpush.msra.mxu1 %v4851_v39  ;;  %2644 = vmatpush.msra.mxu2 %v5337_v37 }
 0x212   : > { %2296 = vmatmul.f32.vlgmr.msra.gmra.mxu3 %v5060_v50  ;;  %v2100_v48 = vsub.f32 %v5054_v19, %v5060_v50 }
 0x213   : > { %2607 = vmatpush.msra.mxu1 %v4857_v36  ;;  %2648 = vmatpush.msra.mxu2 %v2455_v46 }
 0x214   : > { %2711 = vmatpush.msra.mxu3 %v4840_v14  ;;  %v2101_v61 = vand.u32 4294901760, %v2100_v48  ;;  %v5338_v14 = vand.u32 4294901760, %v4897_v23 }
 0x215   : > { %2609 = vmatpush.msra.mxu1 %v4869_v6  ;;  %2652 = vmatpush.msra.mxu2 %v2461_v3 }
 0x216   : > { %2713 = vmatpush.msra.mxu3 %v4851_v39  ;;  %2102 = vmatmul.f32.vlgmr.msra.gmra.mxu0 %v2101_v61  ;;  %v5340_v39 = vand.u32 4294901760, %v4947_v62 }
 0x217   : > { %2402 = vmatmul.f32.vlgmr.msrb.gmra.mxu1 %v5051_v24  ;;  %2550 = vmatpush.msra.mxu0 %v4849_v8  ;;  %v5339_v8 = vand.u32 4294901760, %v4924_v43 }
 0x218   : > { %2611 = vmatpush.msra.mxu1 %v4882_v57  ;;  %2656 = vmatpush.msra.mxu2 %v2467_v33 }
 0x219   : > { %2715 = vmatpush.msra.mxu3 %v4857_v36  ;;  %2443 = vmatmul.f32.vlgmr.msrb.gmra.mxu2 %v2101_v61  ;;  %v2059_v36 = vld [vmem:[%s5219_s6] sm:$0x3] }
 0x21a   : > { %2553 = vmatpush.msra.mxu0 %v4860_v10  ;;  %2613 = vmatpush.msra.mxu1 %v4894_v4  ;;  %v2061_v10 = vperm.slane %v2059_v36, 0 }
 0x21b   : > { %2660 = vmatpush.msra.mxu2 %v5338_v14  ;;  %2717 = vmatpush.msra.mxu3 %v4869_v6 }
 0x21c   : > { %2544 = vmatmul.f32.vlgmr.msrb.gmra.mxu3 %v5051_v24  ;;  %2556 = vmatpush.msra.mxu0 %v4872_v7 }
 0x21d   : > { %2615 = vmatpush.msra.mxu1 %v4905_v25  ;;  %2664 = vmatpush.msra.mxu2 %v2479_v59  ;;  %v1288_v59 = vmul.f32 0.17677669, %v4646_v51 }
 0x21e   : > { %2719 = vmatpush.msra.mxu3 %v4882_v57  ;;  %2559 = vmatpush.msra.mxu0 %v4886_v41  ;;  %v5341_v57 = vand.u32 4294901760, %v4996_v49 }
 0x21f   : > { %2617 = vmatpush.msra.mxu1 %v4921_v40  ;;  %2668 = vmatpush.msra.mxu2 %v5339_v8 }
 0x220   : > { %2721 = vmatpush.msra.mxu3 %v4894_v4  ;;  %2365 = vmatmul.f32.vlgmr.msrb.gmra.mxu0 %v5051_v24 }
 0x221   : > { %2562 = vmatpush.msra.mxu0 %v4897_v23  ;;  %2619 = vmatpush.msra.mxu1 %v4934_v18 }
 0x222   : > { %2672 = vmatpush.msra.mxu2 %v2491_v28  ;;  %2723 = vmatpush.msra.mxu3 %v4905_v25 }
 0x223   : > { %2565 = vmatpush.msra.mxu0 %v4908_v1  ;;  %2621 = vmatpush.msra.mxu1 %v4944_v29 }
 0x224   : > { %2676 = vmatpush.msra.mxu2 %v5340_v39  ;;  %2725 = vmatpush.msra.mxu3 %v4921_v40 }
 0x225   : > { %2568 = vmatpush.msra.mxu0 %v4924_v43  ;;  %2623 = vmatpush.msra.mxu1 %v4955_v22 }
 0x226   : > { %2680 = vmatpush.msra.mxu2 %v2503_v35  ;;  %2727 = vmatpush.msra.mxu3 %v4934_v18 }
 0x227   : > { %2571 = vmatpush.msra.mxu0 %v4938_v17  ;;  %2625 = vmatpush.msra.mxu1 %v4971_v27 }
 0x228   : > { %2684 = vmatpush.msra.mxu2 %v2509_v34  ;;  %2729 = vmatpush.msra.mxu3 %v4944_v29 }
 0x229   : > { %2574 = vmatpush.msra.mxu0 %v4947_v62  ;;  %2627 = vmatpush.msra.mxu1 %v4983_v44 }
 0x22a   : > { %2688 = vmatpush.msra.mxu2 %v2515_v45  ;;  %2731 = vmatpush.msra.mxu3 %v4955_v22 }
 0x22b   : > { %2577 = vmatpush.msra.mxu0 %v4958_v63  ;;  %2629 = vmatpush.msra.mxu1 %v4993_v38 }
 0x22c   : > { %2692 = vmatpush.msra.mxu2 %v5341_v57  ;;  %2733 = vmatpush.msra.mxu3 %v4971_v27 }
 0x22d   : > { %2580 = vmatpush.msra.mxu0 %v4977_v54  ;;  %2631 = vmatpush.msra.mxu1 %v5007_v11 }
 0x22e   : > { %2696 = vmatpush.msra.mxu2 %v2527_v60  ;;  %2735 = vmatpush.msra.mxu3 %v4983_v44 }
 0x22f   : > { %2583 = vmatpush.msra.mxu0 %v4990_v16  ;;  %2633 = vmatpush.msra.mxu1 %v5023_v47 }
 0x230   : > { %2700 = vmatpush.msra.mxu2 %v2533_v0  ;;  %2737 = vmatpush.msra.mxu3 %v4993_v38 }
 0x231   : > { %2637 = vmatmul.f32.vlgmr.msra.gmra.mxu1 %v5060_v50  ;;  %2586 = vmatpush.msra.mxu0 %v4996_v49 }
 0x232   : > { %2704 = vmatpush.msra.mxu2 %v2539_v30  ;;  %2739 = vmatpush.msra.mxu3 %v5007_v11 }
 0x233   : > { %2706 = vmatmul.f32.vlgmr.msra.gmra.mxu2 %v5051_v24  ;;  %2589 = vmatpush.msra.mxu0 %v5010_v15 }
 0x234   : > { %2741 = vmatpush.msra.mxu3 %v5023_v47 }
 0x235   : > { %2743 = vmatmul.f32.vlgmr.msra.gmra.mxu3 %v5051_v24  ;;  %2592 = vmatpush.msra.mxu0 %v5029_v52 }
 0x237   : > { %2595 = vmatpush.msra.mxu0 %v5036_v21 }
 0x238   : > { %2598 = vmatmul.f32.vlgmr.msra.gmra.mxu0 %v5054_v19 }
 0x28b   : > { %v2204_v7 = vpop.f32.mrf.mxu1 }
 0x293   : > { %v2103_v46 = vpop.f32.mrf.mxu0  ;;  %v2258_v41 = vpop.f32.mrf.mxu2 }
 0x294   : > { %v2104_v6 = vadd.f32 %v2103_v46, %v2061_v10  ;;  %v2403_v1 = vpop.f32.mrf.mxu1 }
 0x295   : > { %v2297_v23 = vpop.f32.mrf.mxu3 }
 0x296   : > { %v2205_v3 = vadd.f32 %v2204_v7, %v2104_v6 }
 0x298   : > { %v2259_v4 = vadd.f32 %v2258_v41, %v2205_v3 }
 0x29a   : > { %v2298_v33 = vadd.f32 %v2297_v23, %v2259_v4 }
 0x29d   : > { %v2366_v22 = vpop.f32.mrf.mxu0 }
 0x29e   : > { %v2367_v25 = vadd.f32 %v2366_v22, %v2298_v33 }
 0x2a0   : > { %v2404_v40 = vadd.f32 %v2403_v1, %v2367_v25 }
 0x2a2   : > { %v2747_v43 = vadd.f32 %v2404_v40, %v1288_v59 }
 0x2a4   : > { %v2748_v18 = vmul.f32 0.70710677, %v2747_v43 }
 0x2a6   : > { %2749 = vst [vmem:[%s416_s22] sm:$0xff] %v2748_v18 }
 0x2a7   : > { %3248 = shalt.err (!%p3245_p10)
}
 0x2a8   : > { %2986 = dma.vmem_to_hbm [thread:$0]  (%p3475_p0), %s2775_s2, 128, %s2777_s29, %s2757_s25   ;;  %v2062_v51 = vperm.slane %v2059_v36, 1  ;;  %v2444_v17 = vpop.f32.mrf.mxu2  ;;  %v2545_v62 = vpop.f32.mrf.mxu3 }
 0x2a9   : > { %s2786_s19 = scalar_lea.hbm %s5221_s8, %s2964_s16  ;;  %s423_s9 = scalar_lea.vmem [#allocation12], %s2969_s15 }
 0x2aa   : > { %v2445_v29 = vadd.f32 %v2444_v17, %v2062_v51  ;;  %s2787_s17 = sshll.u32 %s423_s9, 4  ;;  %s2789_s10 = sshll.u32 %s2786_s19, 4  ;;  %s2788_s17 = int_to_ptr.vmem [resolvable:$true] %s2787_s17  ;;  %s2790_s10 = int_to_ptr.hbm [resolvable:$true] %s2789_s10 }
 0x2ab   : > { %s2762_s12 = scalar_lea.sflag [#allocation13], %s3534_s20  ;;  %s3263_s16 = sshra.s32 %s2790_s10, 4  ;;  %s3264_s16 = int_to_ptr.hbm [resolvable:$true] %s3263_s16 }
 0x2ac   : > { %v2546_v28 = vadd.f32 %v2545_v62, %v2445_v29  ;;  %s3265_s22 = scalar_lea.hbm %s3264_s16, 24  ;;  %s3269_s29 = scalar_lea.hbm %s5221_s8, 48 }
 0x2ad   : > { %p3266_p12 = scmp.ne.s32.totalorder %s3264_s16, %s3265_s22  ;;  %p3270_p2 = scmp.lt.s32.totalorder %s3264_s16, %s5221_s8 }
 0x2ae   : > { %v2638_v35 = vpop.f32.mrf.mxu1  ;;  %p3271_p4 = scmp.lt.s32.totalorder %s3269_s29, %s3265_s22 }
 0x2af   : > { %p3267_p5 = pnand %p3266_p12, %p3475_p0 }
 0x2b0   : > { %p3272_p1 = por %p3271_p4, %p3270_p2 }
 0x2b1   : > { %p3268_p11 = pneg %p3267_p5 }
 0x2b3   : > { %p3273_p3 = pnand %p3272_p1, %p3268_p11 }
 0x2b5   : > { %v2599_v44 = vpop.f32.mrf.mxu0 }
 0x2b6   : > { %v2600_v63 = vadd.f32 %v2599_v44, %v2546_v28  ;;  %v2707_v54 = vpop.f32.mrf.mxu2 }
 0x2b8   : > { %v2639_v27 = vadd.f32 %v2638_v35, %v2600_v63  ;;  %v2744_v16 = vpop.f32.mrf.mxu3 }
 0x2ba   : > { %v2708_v34 = vadd.f32 %v2707_v54, %v2639_v27 }
 0x2bc   : > { %v2745_v38 = vadd.f32 %v2744_v16, %v2708_v34 }
 0x2be   : > { %v2750_v49 = vmul.f32 %v2745_v38, %v4635_v56  ;;  %v2751_v45 = vmul.f32 %v2745_v38, %v4638_v58  ;;  %v2752_v21 = vmul.f32 %v2745_v38, %v4642_v20 }
 0x2c0   : > { %2753 = vst [vmem:[%s423_s9] sm:$0xff] %v2750_v49 }
 0x2c1   : > { %2754 = vst [vmem:[%s423_s9 + $0x8] sm:$0xff] %v2751_v45 }
 0x2c2   : > { %2755 = vst [vmem:[%s423_s9 + $0x10] sm:$0xff] %v2752_v21 }
 0x2c3   : > { %3276 = shalt.err (!%p3273_p3)
}
 0x2c4   : > { %s3340_s20 = smov 128   ;;  %s3341_s5 = smov 256  }
 0x2c5   : > { %s3342_s13 = smov 8  }
 0x2c6   : > { %2987 = dma.vmem_to_hbm [thread:$0]  (%p3475_p0), %s2788_s17, 384, %s2790_s10, %s2762_s12, %s3340_s20, %s3341_s5, %s3342_s13  }
 0x2c7 PF: > { %s2804_s26 = sand.u32 1, %s3319_s27   ;;  %p5343_p13 = scmp.ge.s32.totalorder %s3331_s30, 2 }
 0x2c8   : > { %s2805_s14 = scalar_lea.sflag [#allocation4], %s2804_s26 }
 0x2c9   : > { %p3008_p7 = pnand %p5343_p13, %p3483_p6 }
 0x2cb   : > { %p3009_p9 = pneg %p3008_p7 }
 0x2cd   : > { %3310 = dma.done.wait (%p3009_p9), %s2805_s14, 128  }
 0x2ce   : > { %3312 = vsyncadd (%p3009_p9), %s2805_s14, 4294967168  ;;  %s2815_s21 = scalar_lea.sflag [#allocation13], %s2804_s26 }
 0x2cf   : > { %3314 = dma.done.wait (%p3009_p9), %s2815_s21, 384  }
 0x2d0   : > { %3316 = vsyncadd (%p3009_p9), %s2815_s21, 4294966912  ;;  %s5344_s30 = sld [smem:[#allocation21_spill]]  ;;  %s5347_s27 = smov %s3323_s28 }
 0x2d1   : > { %s5345_s11 = sld [smem:[#allocation20_spill]] }
 0x2d2   : > { %s5346_s29 = sld [smem:[#allocation22_spill]] }
 0x2d6   : > { %p29_p0 = scmp.ge.s32.totalorder %s5344_s30, 4  }
 0x2d7   : > { %s5348_s28 = smov %s5345_s11 }
 0x2d8   :  { %31 = sbr.rel (!%p29_p0) target bundleno = 14 (0xe), region = 135 }
 0x2dd   :  { %2821 = vsyncpa [#allocation3], 1 }
 0x2de   :  { %2823 = vsyncpa [#allocation3 + $0x1], 1 }
 0x2df   :  { %2824 = vsyncpa [#allocation6], 1 }
 0x2e0   :  { %2826 = vsyncpa [#allocation6 + $0x1], 1 }
 0x2e1   :  { %2827 = vsyncpa [#allocation9], 1 }
 0x2e2   :  { %2828 = vsyncpa [#allocation4], 1 }
 0x2e3   :  { %2830 = vsyncpa [#allocation4 + $0x1], 1 }
 0x2e4   :  { %2831 = vsyncpa [#allocation13], 1 }
 0x2e5   :  { %2833 = vsyncpa [#allocation13 + $0x1], 1 }

</bundles_post_ra>
